<compile_context>
chip_gen: v6e
topology: v6e:2x2x1
jax: 0.10.0
libtpu: 0.0.40
codegen_flags: <defaults>
</compile_context>

<pallas_src>
import functools

import jax
import jax.numpy as jnp
from jax.experimental import pallas as pl
from jax.experimental.pallas import tpu as pltpu

CLIP_DIM = 512     # CLIP text/image embedding width (fixed by the module)
HIDDEN   = 128     # hidden_dim (kept small + lane-aligned for this synthetic run)
LN_EPS   = 1e-5    # nn.LayerNorm default
NORM_EPS = 1e-12   # F.normalize default

_MAX_TILE_M  = 512              # rows per grid step: ~4 MiB of f32x512 input/buffer
_VMEM_LIMIT  = 32 * 1024 * 1024  # safe on v5e (128 MiB phys), v6e (128), v7x (64)


# ----------------------------------------------------------------------------- kernels
def _l2_normalize(x):
    # x / max(||x||, eps)  ==  x * rsqrt(max(||x||^2, eps^2))  (sqrt is monotone)
    sumsq = jnp.sum(x * x, axis=-1, keepdims=True)
    return x * jax.lax.rsqrt(jnp.maximum(sumsq, NORM_EPS * NORM_EPS))


def query_tower_kernel(x_ref, w1_ref, b1_ref, g_ref, beta_ref,
                       w2_ref, b2_ref, w3_ref, b3_ref, o_ref):
    # Linear -> LayerNorm -> ReLU -> Linear -> ReLU -> Linear -> L2 normalize
    x = x_ref[...]
    h = jnp.dot(x, w1_ref[...], preferred_element_type=jnp.float32) + b1_ref[...]
    # one-pass LayerNorm statistics: var = E[h^2] - E[h]^2
    mu = jnp.mean(h, axis=-1, keepdims=True)
    msq = jnp.mean(h * h, axis=-1, keepdims=True)
    var = msq - mu * mu
    h = (h - mu) * jax.lax.rsqrt(var + LN_EPS) * g_ref[...] + beta_ref[...]
    h = jnp.maximum(h, 0.0)
    h = jnp.maximum(jnp.dot(h, w2_ref[...], preferred_element_type=jnp.float32)
                    + b2_ref[...], 0.0)
    out = jnp.dot(h, w3_ref[...], preferred_element_type=jnp.float32) + b3_ref[...]
    o_ref[...] = _l2_normalize(out)


def item_fusion_kernel(xt_ref, xi_ref,
                       tw1_ref, tb1_ref, tw2_ref, tb2_ref, tw3_ref, tb3_ref,
                       iw1_ref, ib1_ref, iw2_ref, ib2_ref, iw3_ref, ib3_ref,
                       fw1t_ref, fw1i_ref, fb1_ref, fw2_ref, fb2_ref,
                       fw3_ref, fb3_ref, o_ref):
    # text tower: Linear -> ReLU -> Linear -> ReLU -> Linear
    xt = xt_ref[...]
    ht = jnp.maximum(jnp.dot(xt, tw1_ref[...], preferred_element_type=jnp.float32)
                     + tb1_ref[...], 0.0)
    ht = jnp.maximum(jnp.dot(ht, tw2_ref[...], preferred_element_type=jnp.float32)
                     + tb2_ref[...], 0.0)
    ht = jnp.dot(ht, tw3_ref[...], preferred_element_type=jnp.float32) + tb3_ref[...]

    # image tower: Linear -> ReLU -> Linear -> ReLU -> Linear
    xi = xi_ref[...]
    hi = jnp.maximum(jnp.dot(xi, iw1_ref[...], preferred_element_type=jnp.float32)
                     + ib1_ref[...], 0.0)
    hi = jnp.maximum(jnp.dot(hi, iw2_ref[...], preferred_element_type=jnp.float32)
                     + ib2_ref[...], 0.0)
    hi = jnp.dot(hi, iw3_ref[...], preferred_element_type=jnp.float32) + ib3_ref[...]

    # fusion tower with the concat folded into the first matmul:
    #   relu(cat([ht, hi]) @ fw1 + fb1) == relu(ht @ fw1[:h] + hi @ fw1[h:] + fb1)
    f = jnp.maximum(jnp.dot(ht, fw1t_ref[...], preferred_element_type=jnp.float32)
                    + jnp.dot(hi, fw1i_ref[...], preferred_element_type=jnp.float32)
                    + fb1_ref[...], 0.0)
    f = jnp.maximum(jnp.dot(f, fw2_ref[...], preferred_element_type=jnp.float32)
                    + fb2_ref[...], 0.0)
    f = jnp.dot(f, fw3_ref[...], preferred_element_type=jnp.float32) + fb3_ref[...]
    o_ref[...] = _l2_normalize(f)


# ----------------------------------------------------------------------------- wrappers
def _round_up(x, m):
    return ((x + m - 1) // m) * m


def _const_spec(w):
    # full-array block, same block every grid step -> stays VMEM-resident
    return pl.BlockSpec(w.shape, lambda i: (0, 0))


def _tiled_call(kernel, row_inputs, weights, out_dim):
    """Run `kernel` over row-tiled inputs; weights are grid-invariant."""
    m = row_inputs[0].shape[0]
    tile_m = min(_MAX_TILE_M, _round_up(max(m, 1), 8))
    padded_m = _round_up(m, tile_m)
    if padded_m != m:
        row_inputs = [jnp.pad(x, ((0, padded_m - m), (0, 0))) for x in row_inputs]
    grid = (padded_m // tile_m,)

    in_specs = [pl.BlockSpec((tile_m, x.shape[1]), lambda i: (i, 0))
                for x in row_inputs]
    in_specs += [_const_spec(w) for w in weights]

    out = pl.pallas_call(
        kernel,
        out_shape=jax.ShapeDtypeStruct((padded_m, out_dim), jnp.float32),
        grid=grid,
        in_specs=in_specs,
        out_specs=pl.BlockSpec((tile_m, out_dim), lambda i: (i, 0)),
        compiler_params=pltpu.CompilerParams(
            dimension_semantics=("parallel",),   # lets v7x split rows across its 2 TCs
            vmem_limit_bytes=_VMEM_LIMIT),
    )(*row_inputs, *weights)
    return out[:m] if padded_m != m else out


# ----------------------------------------------------------------------------- params
def _linear(key, fan_in, fan_out):
    kw, kb = jax.random.split(key)
    bound = 1.0 / jnp.sqrt(fan_in)
    w = jax.random.uniform(kw, (fan_in, fan_out), jnp.float32, -bound, bound)
    b = jax.random.uniform(kb, (1, fan_out), jnp.float32, -bound, bound)
    return w, b


def make_params(key):
    ks = jax.random.split(key, 6)

    # query tower: Linear(512,h), LayerNorm(h), Linear(h,h), Linear(h,h)
    qw1, qb1 = _linear(ks[0], CLIP_DIM, HIDDEN)
    qg = jnp.ones((1, HIDDEN), jnp.float32)
    qbeta = jnp.zeros((1, HIDDEN), jnp.float32)
    qw2, qb2 = _linear(ks[1], HIDDEN, HIDDEN)
    qw3, qb3 = _linear(ks[2], HIDDEN, HIDDEN)
    query_p = (qw1, qb1, qg, qbeta, qw2, qb2, qw3, qb3)

    # text / image towers: Linear(512,h), Linear(h,h), Linear(h,h)
    def plain(k):
        k1, k2, k3 = jax.random.split(k, 3)
        w1, b1 = _linear(k1, CLIP_DIM, HIDDEN)
        w2, b2 = _linear(k2, HIDDEN, HIDDEN)
        w3, b3 = _linear(k3, HIDDEN, HIDDEN)
        return (w1, b1, w2, b2, w3, b3)

    text_p = plain(ks[3])
    image_p = plain(ks[4])

    # fusion tower: Linear(2h,2h), Linear(2h,2h), Linear(2h,h)
    k1, k2, k3 = jax.random.split(ks[5], 3)
    fw1, fb1 = _linear(k1, 2 * HIDDEN, 2 * HIDDEN)
    fw2, fb2 = _linear(k2, 2 * HIDDEN, 2 * HIDDEN)
    fw3, fb3 = _linear(k3, 2 * HIDDEN, HIDDEN)
    fusion_p = (fw1, fb1, fw2, fb2, fw3, fb3)

    return query_p, text_p, image_p, fusion_p


# ----------------------------------------------------------------------------- forward
@jax.jit
def three_tower_forward(query_emb, pos_text_emb, pos_image_emb,
                        neg_text_emb, neg_image_emb,
                        query_p, text_p, image_p, fusion_p):
    B = query_emb.shape[0]
    N = neg_text_emb.shape[1]

    # launch 1: query tower
    q = _tiled_call(query_tower_kernel, [query_emb], query_p, HIDDEN)     # (B, h)

    # launch 2: text+image+fusion towers, pos and neg rows batched together
    text_all = jnp.concatenate(
        [pos_text_emb, neg_text_emb.reshape(B * N, CLIP_DIM)], axis=0)    # (B*(N+1), 512)
    image_all = jnp.concatenate(
        [pos_image_emb, neg_image_emb.reshape(B * N, CLIP_DIM)], axis=0)  # (B*(N+1), 512)

    fw1, fb1, fw2, fb2, fw3, fb3 = fusion_p
    fused_weights = (*text_p, *image_p,
                     fw1[:HIDDEN, :], fw1[HIDDEN:, :], fb1, fw2, fb2, fw3, fb3)
    fused = _tiled_call(item_fusion_kernel, [text_all, image_all],
                        fused_weights, HIDDEN)                            # (B*(N+1), h)

    pos = fused[:B]                                                       # (B, h)
    neg = fused[B:].reshape(B, N, HIDDEN)                                 # (B, N, h)
    return q, pos, neg


# ----------------------------------------------------------------------------- reference
def _ref_forward(query_emb, pos_text_emb, pos_image_emb, neg_text_emb, neg_image_emb,
                 query_p, text_p, image_p, fusion_p):
    def lin(x, w, b):
        return x @ w + b

    def l2n(x):
        return x / jnp.maximum(jnp.linalg.norm(x, axis=-1, keepdims=True), NORM_EPS)

    def qtow(x):
        qw1, qb1, g, beta, qw2, qb2, qw3, qb3 = query_p
        h = lin(x, qw1, qb1)
        mu = h.mean(-1, keepdims=True)
        var = ((h - mu) ** 2).mean(-1, keepdims=True)
        h = (h - mu) / jnp.sqrt(var + LN_EPS) * g + beta
        h = jax.nn.relu(h)
        h = jax.nn.relu(lin(h, qw2, qb2))
        return l2n(lin(h, qw3, qb3))

    def tow(x, p):
        w1, b1, w2, b2, w3, b3 = p
        h = jax.nn.relu(lin(x, w1, b1))
        h = jax.nn.relu(lin(h, w2, b2))
        return lin(h, w3, b3)

    def fus(x):
        w1, b1, w2, b2, w3, b3 = fusion_p
        h = jax.nn.relu(lin(x, w1, b1))
        h = jax.nn.relu(lin(h, w2, b2))
        return l2n(lin(h, w3, b3))

    B, N = query_emb.shape[0], neg_text_emb.shape[1]
    q = qtow(query_emb)
    pt, pi = tow(pos_text_emb, text_p), tow(pos_image_emb, image_p)
    nt = tow(neg_text_emb.reshape(B * N, -1), text_p)
    ni = tow(neg_image_emb.reshape(B * N, -1), image_p)
    pos = fus(jnp.concatenate([pt, pi], 1))
    neg = fus(jnp.concatenate([nt, ni], 1)).reshape(B, N, HIDDEN)
    return q, pos, neg


# ----------------------------------------------------------------------------- main
if __name__ == "__main__":
    B, N_NEG = 2, 3
    key = jax.random.PRNGKey(0)
    k_params, k_q, k_pt, k_pi, k_nt, k_ni = jax.random.split(key, 6)

    query_p, text_p, image_p, fusion_p = make_params(k_params)

    query_emb = jax.random.normal(k_q, (B, CLIP_DIM), jnp.float32)
    pos_text_emb = jax.random.normal(k_pt, (B, CLIP_DIM), jnp.float32)
    pos_image_emb = jax.random.normal(k_pi, (B, CLIP_DIM), jnp.float32)
    neg_text_emb = jax.random.normal(k_nt, (B, N_NEG, CLIP_DIM), jnp.float32)
    neg_image_emb = jax.random.normal(k_ni, (B, N_NEG, CLIP_DIM), jnp.float32)

    q, pos, neg = three_tower_forward(
        query_emb, pos_text_emb, pos_image_emb, neg_text_emb, neg_image_emb,
        query_p, text_p, image_p, fusion_p)
    jax.block_until_ready((q, pos, neg))

    # sanity check against a pure-JAX reference
    q_r, pos_r, neg_r = _ref_forward(
        query_emb, pos_text_emb, pos_image_emb, neg_text_emb, neg_image_emb,
        query_p, text_p, image_p, fusion_p)
    assert q.shape == (B, HIDDEN) and pos.shape == (B, HIDDEN) and neg.shape == (B, N_NEG, HIDDEN)
    assert jnp.allclose(q, q_r, atol=1e-4, rtol=1e-4)
    assert jnp.allclose(pos, pos_r, atol=1e-4, rtol=1e-4)
    assert jnp.allclose(neg, neg_r, atol=1e-4, rtol=1e-4)

    print("KERNEL_OK")
</pallas_src>

<mosaic_0001>
module attributes {stable_mosaic.version = 11 : i64} {
  func.func @query_tower_kernel(%arg0: i32, %arg1: memref<8x512xf32, #tpu.memory_space<vmem>>, %arg2: memref<512x128xf32, #tpu.memory_space<vmem>>, %arg3: memref<1x128xf32, #tpu.memory_space<vmem>>, %arg4: memref<1x128xf32, #tpu.memory_space<vmem>>, %arg5: memref<1x128xf32, #tpu.memory_space<vmem>>, %arg6: memref<128x128xf32, #tpu.memory_space<vmem>>, %arg7: memref<1x128xf32, #tpu.memory_space<vmem>>, %arg8: memref<128x128xf32, #tpu.memory_space<vmem>>, %arg9: memref<1x128xf32, #tpu.memory_space<vmem>>, %arg10: memref<8x128xf32, #tpu.memory_space<vmem>>) attributes {dimension_semantics = [#tpu.dimension_semantics<parallel>], iteration_bounds = array<i64: 1>, scalar_prefetch = 0 : i64, scratch_operands = 0 : i64, tpu.core_type = #tpu.core_type<tc>, window_params = [{transform_indices = @transform_0, window_bounds = array<i64: 8, 512>}, {pipeline_mode = #tpu.pipeline_mode<synchronous>, transform_indices = @transform_1, window_bounds = array<i64: 512, 128>}, {pipeline_mode = #tpu.pipeline_mode<synchronous>, transform_indices = @transform_2, window_bounds = array<i64: 1, 128>}, {pipeline_mode = #tpu.pipeline_mode<synchronous>, transform_indices = @transform_3, window_bounds = array<i64: 1, 128>}, {pipeline_mode = #tpu.pipeline_mode<synchronous>, transform_indices = @transform_4, window_bounds = array<i64: 1, 128>}, {pipeline_mode = #tpu.pipeline_mode<synchronous>, transform_indices = @transform_5, window_bounds = array<i64: 128, 128>}, {pipeline_mode = #tpu.pipeline_mode<synchronous>, transform_indices = @transform_6, window_bounds = array<i64: 1, 128>}, {pipeline_mode = #tpu.pipeline_mode<synchronous>, transform_indices = @transform_7, window_bounds = array<i64: 128, 128>}, {pipeline_mode = #tpu.pipeline_mode<synchronous>, transform_indices = @transform_8, window_bounds = array<i64: 1, 128>}, {transform_indices = @transform_9, window_bounds = array<i64: 8, 128>}]} {
    %c0 = arith.constant 0 : index
    %c0_0 = arith.constant 0 : index
    %0 = vector.load %arg1[%c0, %c0_0] : memref<8x512xf32, #tpu.memory_space<vmem>>, vector<8x512xf32>
    %c0_1 = arith.constant 0 : index
    %c0_2 = arith.constant 0 : index
    %1 = vector.load %arg2[%c0_1, %c0_2] : memref<512x128xf32, #tpu.memory_space<vmem>>, vector<512x128xf32>
    %cst = arith.constant dense<0.000000e+00> : vector<8x128xf32>
    %2 = tpu.matmul %0, %1, %cst {dimension_numbers = #tpu.dot_dimension_numbers<[1], [0], [0], [1], [0, 0, 1, 1], [], []>} : vector<8x512xf32>, vector<512x128xf32>, vector<8x128xf32> -> vector<8x128xf32>
    %c0_3 = arith.constant 0 : index
    %c0_4 = arith.constant 0 : index
    %3 = vector.load %arg3[%c0_3, %c0_4] : memref<1x128xf32, #tpu.memory_space<vmem>>, vector<1x128xf32>
    %4 = vector.broadcast %3 : vector<1x128xf32> to vector<8x128xf32>
    %5 = arith.addf %2, %4 : vector<8x128xf32>
    %cst_5 = arith.constant dense<0.000000e+00> : vector<8xf32>
    %6 = vector.multi_reduction <add>, %5, %cst_5 [1] : vector<8x128xf32> to vector<8xf32>
    %7 = vector.shape_cast %6 : vector<8xf32> to vector<8x1xf32>
    %cst_6 = arith.constant 1.280000e+02 : f32
    %8 = vector.broadcast %cst_6 : f32 to vector<8x1xf32>
    %9 = arith.divf %7, %8 : vector<8x1xf32>
    %10 = arith.mulf %5, %5 : vector<8x128xf32>
    %cst_7 = arith.constant dense<0.000000e+00> : vector<8xf32>
    %11 = vector.multi_reduction <add>, %10, %cst_7 [1] : vector<8x128xf32> to vector<8xf32>
    %12 = vector.shape_cast %11 : vector<8xf32> to vector<8x1xf32>
    %cst_8 = arith.constant 1.280000e+02 : f32
    %13 = vector.broadcast %cst_8 : f32 to vector<8x1xf32>
    %14 = arith.divf %12, %13 : vector<8x1xf32>
    %15 = arith.mulf %9, %9 : vector<8x1xf32>
    %16 = arith.subf %14, %15 : vector<8x1xf32>
    %17 = vector.broadcast %9 : vector<8x1xf32> to vector<8x128xf32>
    %18 = arith.subf %5, %17 : vector<8x128xf32>
    %cst_9 = arith.constant 9.99999974E-6 : f32
    %19 = vector.broadcast %cst_9 : f32 to vector<8x1xf32>
    %20 = arith.addf %16, %19 : vector<8x1xf32>
    %21 = math.rsqrt %20 : vector<8x1xf32>
    %22 = vector.broadcast %21 : vector<8x1xf32> to vector<8x128xf32>
    %23 = arith.mulf %18, %22 : vector<8x128xf32>
    %c0_10 = arith.constant 0 : index
    %c0_11 = arith.constant 0 : index
    %24 = vector.load %arg4[%c0_10, %c0_11] : memref<1x128xf32, #tpu.memory_space<vmem>>, vector<1x128xf32>
    %25 = vector.broadcast %24 : vector<1x128xf32> to vector<8x128xf32>
    %26 = arith.mulf %23, %25 : vector<8x128xf32>
    %c0_12 = arith.constant 0 : index
    %c0_13 = arith.constant 0 : index
    %27 = vector.load %arg5[%c0_12, %c0_13] : memref<1x128xf32, #tpu.memory_space<vmem>>, vector<1x128xf32>
    %28 = vector.broadcast %27 : vector<1x128xf32> to vector<8x128xf32>
    %29 = arith.addf %26, %28 : vector<8x128xf32>
    %cst_14 = arith.constant 0.000000e+00 : f32
    %30 = vector.broadcast %cst_14 : f32 to vector<8x128xf32>
    %31 = arith.maximumf %29, %30 : vector<8x128xf32>
    %c0_15 = arith.constant 0 : index
    %c0_16 = arith.constant 0 : index
    %32 = vector.load %arg6[%c0_15, %c0_16] : memref<128x128xf32, #tpu.memory_space<vmem>>, vector<128x128xf32>
    %cst_17 = arith.constant dense<0.000000e+00> : vector<8x128xf32>
    %33 = tpu.matmul %31, %32, %cst_17 {dimension_numbers = #tpu.dot_dimension_numbers<[1], [0], [0], [1], [0, 0, 1, 1], [], []>} : vector<8x128xf32>, vector<128x128xf32>, vector<8x128xf32> -> vector<8x128xf32>
    %c0_18 = arith.constant 0 : index
    %c0_19 = arith.constant 0 : index
    %34 = vector.load %arg7[%c0_18, %c0_19] : memref<1x128xf32, #tpu.memory_space<vmem>>, vector<1x128xf32>
    %35 = vector.broadcast %34 : vector<1x128xf32> to vector<8x128xf32>
    %36 = arith.addf %33, %35 : vector<8x128xf32>
    %cst_20 = arith.constant 0.000000e+00 : f32
    %37 = vector.broadcast %cst_20 : f32 to vector<8x128xf32>
    %38 = arith.maximumf %36, %37 : vector<8x128xf32>
    %c0_21 = arith.constant 0 : index
    %c0_22 = arith.constant 0 : index
    %39 = vector.load %arg8[%c0_21, %c0_22] : memref<128x128xf32, #tpu.memory_space<vmem>>, vector<128x128xf32>
    %cst_23 = arith.constant dense<0.000000e+00> : vector<8x128xf32>
    %40 = tpu.matmul %38, %39, %cst_23 {dimension_numbers = #tpu.dot_dimension_numbers<[1], [0], [0], [1], [0, 0, 1, 1], [], []>} : vector<8x128xf32>, vector<128x128xf32>, vector<8x128xf32> -> vector<8x128xf32>
    %c0_24 = arith.constant 0 : index
    %c0_25 = arith.constant 0 : index
    %41 = vector.load %arg9[%c0_24, %c0_25] : memref<1x128xf32, #tpu.memory_space<vmem>>, vector<1x128xf32>
    %42 = vector.broadcast %41 : vector<1x128xf32> to vector<8x128xf32>
    %43 = arith.addf %40, %42 : vector<8x128xf32>
    %44 = arith.mulf %43, %43 : vector<8x128xf32>
    %cst_26 = arith.constant dense<0.000000e+00> : vector<8xf32>
    %45 = vector.multi_reduction <add>, %44, %cst_26 [1] : vector<8x128xf32> to vector<8xf32>
    %46 = vector.shape_cast %45 : vector<8xf32> to vector<8x1xf32>
    %cst_27 = arith.constant 1.000000e-24 : f32
    %47 = vector.broadcast %cst_27 : f32 to vector<8x1xf32>
    %48 = arith.maximumf %46, %47 : vector<8x1xf32>
    %49 = math.rsqrt %48 : vector<8x1xf32>
    %50 = vector.broadcast %49 : vector<8x1xf32> to vector<8x128xf32>
    %51 = arith.mulf %43, %50 : vector<8x128xf32>
    %c0_28 = arith.constant 0 : index
    %c0_29 = arith.constant 0 : index
    %52 = vector.load %arg10[%c0_28, %c0_29] : memref<8x128xf32, #tpu.memory_space<vmem>>, vector<8x128xf32>
    tpu.vector_store %arg10[%c0_28, %c0_29], %51 {strides = array<i32>} : memref<8x128xf32, #tpu.memory_space<vmem>>, vector<8x128xf32>,
    return
  }
  func.func @transform_0(%arg0: i32) -> (i32, i32) {
    %c0_i32 = arith.constant 0 : i32
    %c0_i32_0 = arith.constant 0 : i32
    return %arg0, %c0_i32 : i32, i32
  }
  func.func @transform_1(%arg0: i32) -> (i32, i32) {
    %c0_i32 = arith.constant 0 : i32
    %c0_i32_0 = arith.constant 0 : i32
    %c0_i32_1 = arith.constant 0 : i32
    return %c0_i32, %c0_i32_0 : i32, i32
  }
  func.func @transform_2(%arg0: i32) -> (i32, i32) {
    %c0_i32 = arith.constant 0 : i32
    %c0_i32_0 = arith.constant 0 : i32
    %c0_i32_1 = arith.constant 0 : i32
    return %c0_i32, %c0_i32_0 : i32, i32
  }
  func.func @transform_3(%arg0: i32) -> (i32, i32) {
    %c0_i32 = arith.constant 0 : i32
    %c0_i32_0 = arith.constant 0 : i32
    %c0_i32_1 = arith.constant 0 : i32
    return %c0_i32, %c0_i32_0 : i32, i32
  }
  func.func @transform_4(%arg0: i32) -> (i32, i32) {
    %c0_i32 = arith.constant 0 : i32
    %c0_i32_0 = arith.constant 0 : i32
    %c0_i32_1 = arith.constant 0 : i32
    return %c0_i32, %c0_i32_0 : i32, i32
  }
  func.func @transform_5(%arg0: i32) -> (i32, i32) {
    %c0_i32 = arith.constant 0 : i32
    %c0_i32_0 = arith.constant 0 : i32
    %c0_i32_1 = arith.constant 0 : i32
    return %c0_i32, %c0_i32_0 : i32, i32
  }
  func.func @transform_6(%arg0: i32) -> (i32, i32) {
    %c0_i32 = arith.constant 0 : i32
    %c0_i32_0 = arith.constant 0 : i32
    %c0_i32_1 = arith.constant 0 : i32
    return %c0_i32, %c0_i32_0 : i32, i32
  }
  func.func @transform_7(%arg0: i32) -> (i32, i32) {
    %c0_i32 = arith.constant 0 : i32
    %c0_i32_0 = arith.constant 0 : i32
    %c0_i32_1 = arith.constant 0 : i32
    return %c0_i32, %c0_i32_0 : i32, i32
  }
  func.func @transform_8(%arg0: i32) -> (i32, i32) {
    %c0_i32 = arith.constant 0 : i32
    %c0_i32_0 = arith.constant 0 : i32
    %c0_i32_1 = arith.constant 0 : i32
    return %c0_i32, %c0_i32_0 : i32, i32
  }
  func.func @transform_9(%arg0: i32) -> (i32, i32) {
    %c0_i32 = arith.constant 0 : i32
    %c0_i32_0 = arith.constant 0 : i32
    return %arg0, %c0_i32 : i32, i32
  }
}

module attributes {stable_mosaic.version = 11 : i64} {
  func.func @item_fusion_kernel(%arg0: i32, %arg1: memref<8x512xf32, #tpu.memory_space<vmem>>, %arg2: memref<8x512xf32, #tpu.memory_space<vmem>>, %arg3: memref<512x128xf32, #tpu.memory_space<vmem>>, %arg4: memref<1x128xf32, #tpu.memory_space<vmem>>, %arg5: memref<128x128xf32, #tpu.memory_space<vmem>>, %arg6: memref<1x128xf32, #tpu.memory_space<vmem>>, %arg7: memref<128x128xf32, #tpu.memory_space<vmem>>, %arg8: memref<1x128xf32, #tpu.memory_space<vmem>>, %arg9: memref<512x128xf32, #tpu.memory_space<vmem>>, %arg10: memref<1x128xf32, #tpu.memory_space<vmem>>, %arg11: memref<128x128xf32, #tpu.memory_space<vmem>>, %arg12: memref<1x128xf32, #tpu.memory_space<vmem>>, %arg13: memref<128x128xf32, #tpu.memory_space<vmem>>, %arg14: memref<1x128xf32, #tpu.memory_space<vmem>>, %arg15: memref<128x256xf32, #tpu.memory_space<vmem>>, %arg16: memref<128x256xf32, #tpu.memory_space<vmem>>, %arg17: memref<1x256xf32, #tpu.memory_space<vmem>>, %arg18: memref<256x256xf32, #tpu.memory_space<vmem>>, %arg19: memref<1x256xf32, #tpu.memory_space<vmem>>, %arg20: memref<256x128xf32, #tpu.memory_space<vmem>>, %arg21: memref<1x128xf32, #tpu.memory_space<vmem>>, %arg22: memref<8x128xf32, #tpu.memory_space<vmem>>) attributes {dimension_semantics = [#tpu.dimension_semantics<parallel>], iteration_bounds = array<i64: 1>, scalar_prefetch = 0 : i64, scratch_operands = 0 : i64, tpu.core_type = #tpu.core_type<tc>, window_params = [{transform_indices = @transform_0, window_bounds = array<i64: 8, 512>}, {transform_indices = @transform_1, window_bounds = array<i64: 8, 512>}, {pipeline_mode = #tpu.pipeline_mode<synchronous>, transform_indices = @transform_2, window_bounds = array<i64: 512, 128>}, {pipeline_mode = #tpu.pipeline_mode<synchronous>, transform_indices = @transform_3, window_bounds = array<i64: 1, 128>}, {pipeline_mode = #tpu.pipeline_mode<synchronous>, transform_indices = @transform_4, window_bounds = array<i64: 128, 128>}, {pipeline_mode = #tpu.pipeline_mode<synchronous>, transform_indices = @transform_5, window_bounds = array<i64: 1, 128>}, {pipeline_mode = #tpu.pipeline_mode<synchronous>, transform_indices = @transform_6, window_bounds = array<i64: 128, 128>}, {pipeline_mode = #tpu.pipeline_mode<synchronous>, transform_indices = @transform_7, window_bounds = array<i64: 1, 128>}, {pipeline_mode = #tpu.pipeline_mode<synchronous>, transform_indices = @transform_8, window_bounds = array<i64: 512, 128>}, {pipeline_mode = #tpu.pipeline_mode<synchronous>, transform_indices = @transform_9, window_bounds = array<i64: 1, 128>}, {pipeline_mode = #tpu.pipeline_mode<synchronous>, transform_indices = @transform_10, window_bounds = array<i64: 128, 128>}, {pipeline_mode = #tpu.pipeline_mode<synchronous>, transform_indices = @transform_11, window_bounds = array<i64: 1, 128>}, {pipeline_mode = #tpu.pipeline_mode<synchronous>, transform_indices = @transform_12, window_bounds = array<i64: 128, 128>}, {pipeline_mode = #tpu.pipeline_mode<synchronous>, transform_indices = @transform_13, window_bounds = array<i64: 1, 128>}, {pipeline_mode = #tpu.pipeline_mode<synchronous>, transform_indices = @transform_14, window_bounds = array<i64: 128, 256>}, {pipeline_mode = #tpu.pipeline_mode<synchronous>, transform_indices = @transform_15, window_bounds = array<i64: 128, 256>}, {pipeline_mode = #tpu.pipeline_mode<synchronous>, transform_indices = @transform_16, window_bounds = array<i64: 1, 256>}, {pipeline_mode = #tpu.pipeline_mode<synchronous>, transform_indices = @transform_17, window_bounds = array<i64: 256, 256>}, {pipeline_mode = #tpu.pipeline_mode<synchronous>, transform_indices = @transform_18, window_bounds = array<i64: 1, 256>}, {pipeline_mode = #tpu.pipeline_mode<synchronous>, transform_indices = @transform_19, window_bounds = array<i64: 256, 128>}, {pipeline_mode = #tpu.pipeline_mode<synchronous>, transform_indices = @transform_20, window_bounds = array<i64: 1, 128>}, {transform_indices = @transform_21, window_bounds = array<i64: 8, 128>}]} {
    %c0 = arith.constant 0 : index
    %c0_0 = arith.constant 0 : index
    %0 = vector.load %arg1[%c0, %c0_0] : memref<8x512xf32, #tpu.memory_space<vmem>>, vector<8x512xf32>
    %c0_1 = arith.constant 0 : index
    %c0_2 = arith.constant 0 : index
    %1 = vector.load %arg3[%c0_1, %c0_2] : memref<512x128xf32, #tpu.memory_space<vmem>>, vector<512x128xf32>
    %cst = arith.constant dense<0.000000e+00> : vector<8x128xf32>
    %2 = tpu.matmul %0, %1, %cst {dimension_numbers = #tpu.dot_dimension_numbers<[1], [0], [0], [1], [0, 0, 1, 1], [], []>} : vector<8x512xf32>, vector<512x128xf32>, vector<8x128xf32> -> vector<8x128xf32>
    %c0_3 = arith.constant 0 : index
    %c0_4 = arith.constant 0 : index
    %3 = vector.load %arg4[%c0_3, %c0_4] : memref<1x128xf32, #tpu.memory_space<vmem>>, vector<1x128xf32>
    %4 = vector.broadcast %3 : vector<1x128xf32> to vector<8x128xf32>
    %5 = arith.addf %2, %4 : vector<8x128xf32>
    %cst_5 = arith.constant 0.000000e+00 : f32
    %6 = vector.broadcast %cst_5 : f32 to vector<8x128xf32>
    %7 = arith.maximumf %5, %6 : vector<8x128xf32>
    %c0_6 = arith.constant 0 : index
    %c0_7 = arith.constant 0 : index
    %8 = vector.load %arg5[%c0_6, %c0_7] : memref<128x128xf32, #tpu.memory_space<vmem>>, vector<128x128xf32>
    %cst_8 = arith.constant dense<0.000000e+00> : vector<8x128xf32>
    %9 = tpu.matmul %7, %8, %cst_8 {dimension_numbers = #tpu.dot_dimension_numbers<[1], [0], [0], [1], [0, 0, 1, 1], [], []>} : vector<8x128xf32>, vector<128x128xf32>, vector<8x128xf32> -> vector<8x128xf32>
    %c0_9 = arith.constant 0 : index
    %c0_10 = arith.constant 0 : index
    %10 = vector.load %arg6[%c0_9, %c0_10] : memref<1x128xf32, #tpu.memory_space<vmem>>, vector<1x128xf32>
    %11 = vector.broadcast %10 : vector<1x128xf32> to vector<8x128xf32>
    %12 = arith.addf %9, %11 : vector<8x128xf32>
    %cst_11 = arith.constant 0.000000e+00 : f32
    %13 = vector.broadcast %cst_11 : f32 to vector<8x128xf32>
    %14 = arith.maximumf %12, %13 : vector<8x128xf32>
    %c0_12 = arith.constant 0 : index
    %c0_13 = arith.constant 0 : index
    %15 = vector.load %arg7[%c0_12, %c0_13] : memref<128x128xf32, #tpu.memory_space<vmem>>, vector<128x128xf32>
    %cst_14 = arith.constant dense<0.000000e+00> : vector<8x128xf32>
    %16 = tpu.matmul %14, %15, %cst_14 {dimension_numbers = #tpu.dot_dimension_numbers<[1], [0], [0], [1], [0, 0, 1, 1], [], []>} : vector<8x128xf32>, vector<128x128xf32>, vector<8x128xf32> -> vector<8x128xf32>
    %c0_15 = arith.constant 0 : index
    %c0_16 = arith.constant 0 : index
    %17 = vector.load %arg8[%c0_15, %c0_16] : memref<1x128xf32, #tpu.memory_space<vmem>>, vector<1x128xf32>
    %18 = vector.broadcast %17 : vector<1x128xf32> to vector<8x128xf32>
    %19 = arith.addf %16, %18 : vector<8x128xf32>
    %c0_17 = arith.constant 0 : index
    %c0_18 = arith.constant 0 : index
    %20 = vector.load %arg2[%c0_17, %c0_18] : memref<8x512xf32, #tpu.memory_space<vmem>>, vector<8x512xf32>
    %c0_19 = arith.constant 0 : index
    %c0_20 = arith.constant 0 : index
    %21 = vector.load %arg9[%c0_19, %c0_20] : memref<512x128xf32, #tpu.memory_space<vmem>>, vector<512x128xf32>
    %cst_21 = arith.constant dense<0.000000e+00> : vector<8x128xf32>
    %22 = tpu.matmul %20, %21, %cst_21 {dimension_numbers = #tpu.dot_dimension_numbers<[1], [0], [0], [1], [0, 0, 1, 1], [], []>} : vector<8x512xf32>, vector<512x128xf32>, vector<8x128xf32> -> vector<8x128xf32>
    %c0_22 = arith.constant 0 : index
    %c0_23 = arith.constant 0 : index
    %23 = vector.load %arg10[%c0_22, %c0_23] : memref<1x128xf32, #tpu.memory_space<vmem>>, vector<1x128xf32>
    %24 = vector.broadcast %23 : vector<1x128xf32> to vector<8x128xf32>
    %25 = arith.addf %22, %24 : vector<8x128xf32>
    %cst_24 = arith.constant 0.000000e+00 : f32
    %26 = vector.broadcast %cst_24 : f32 to vector<8x128xf32>
    %27 = arith.maximumf %25, %26 : vector<8x128xf32>
    %c0_25 = arith.constant 0 : index
    %c0_26 = arith.constant 0 : index
    %28 = vector.load %arg11[%c0_25, %c0_26] : memref<128x128xf32, #tpu.memory_space<vmem>>, vector<128x128xf32>
    %cst_27 = arith.constant dense<0.000000e+00> : vector<8x128xf32>
    %29 = tpu.matmul %27, %28, %cst_27 {dimension_numbers = #tpu.dot_dimension_numbers<[1], [0], [0], [1], [0, 0, 1, 1], [], []>} : vector<8x128xf32>, vector<128x128xf32>, vector<8x128xf32> -> vector<8x128xf32>
    %c0_28 = arith.constant 0 : index
    %c0_29 = arith.constant 0 : index
    %30 = vector.load %arg12[%c0_28, %c0_29] : memref<1x128xf32, #tpu.memory_space<vmem>>, vector<1x128xf32>
    %31 = vector.broadcast %30 : vector<1x128xf32> to vector<8x128xf32>
    %32 = arith.addf %29, %31 : vector<8x128xf32>
    %cst_30 = arith.constant 0.000000e+00 : f32
    %33 = vector.broadcast %cst_30 : f32 to vector<8x128xf32>
    %34 = arith.maximumf %32, %33 : vector<8x128xf32>
    %c0_31 = arith.constant 0 : index
    %c0_32 = arith.constant 0 : index
    %35 = vector.load %arg13[%c0_31, %c0_32] : memref<128x128xf32, #tpu.memory_space<vmem>>, vector<128x128xf32>
    %cst_33 = arith.constant dense<0.000000e+00> : vector<8x128xf32>
    %36 = tpu.matmul %34, %35, %cst_33 {dimension_numbers = #tpu.dot_dimension_numbers<[1], [0], [0], [1], [0, 0, 1, 1], [], []>} : vector<8x128xf32>, vector<128x128xf32>, vector<8x128xf32> -> vector<8x128xf32>
    %c0_34 = arith.constant 0 : index
    %c0_35 = arith.constant 0 : index
    %37 = vector.load %arg14[%c0_34, %c0_35] : memref<1x128xf32, #tpu.memory_space<vmem>>, vector<1x128xf32>
    %38 = vector.broadcast %37 : vector<1x128xf32> to vector<8x128xf32>
    %39 = arith.addf %36, %38 : vector<8x128xf32>
    %c0_36 = arith.constant 0 : index
    %c0_37 = arith.constant 0 : index
    %40 = vector.load %arg15[%c0_36, %c0_37] : memref<128x256xf32, #tpu.memory_space<vmem>>, vector<128x256xf32>
    %cst_38 = arith.constant dense<0.000000e+00> : vector<8x256xf32>
    %41 = tpu.matmul %19, %40, %cst_38 {dimension_numbers = #tpu.dot_dimension_numbers<[1], [0], [0], [1], [0, 0, 1, 1], [], []>} : vector<8x128xf32>, vector<128x256xf32>, vector<8x256xf32> -> vector<8x256xf32>
    %c0_39 = arith.constant 0 : index
    %c0_40 = arith.constant 0 : index
    %42 = vector.load %arg16[%c0_39, %c0_40] : memref<128x256xf32, #tpu.memory_space<vmem>>, vector<128x256xf32>
    %cst_41 = arith.constant dense<0.000000e+00> : vector<8x256xf32>
    %43 = tpu.matmul %39, %42, %cst_41 {dimension_numbers = #tpu.dot_dimension_numbers<[1], [0], [0], [1], [0, 0, 1, 1], [], []>} : vector<8x128xf32>, vector<128x256xf32>, vector<8x256xf32> -> vector<8x256xf32>
    %44 = arith.addf %41, %43 : vector<8x256xf32>
    %c0_42 = arith.constant 0 : index
    %c0_43 = arith.constant 0 : index
    %45 = vector.load %arg17[%c0_42, %c0_43] : memref<1x256xf32, #tpu.memory_space<vmem>>, vector<1x256xf32>
    %46 = vector.broadcast %45 : vector<1x256xf32> to vector<8x256xf32>
    %47 = arith.addf %44, %46 : vector<8x256xf32>
    %cst_44 = arith.constant 0.000000e+00 : f32
    %48 = vector.broadcast %cst_44 : f32 to vector<8x256xf32>
    %49 = arith.maximumf %47, %48 : vector<8x256xf32>
    %c0_45 = arith.constant 0 : index
    %c0_46 = arith.constant 0 : index
    %50 = vector.load %arg18[%c0_45, %c0_46] : memref<256x256xf32, #tpu.memory_space<vmem>>, vector<256x256xf32>
    %cst_47 = arith.constant dense<0.000000e+00> : vector<8x256xf32>
    %51 = tpu.matmul %49, %50, %cst_47 {dimension_numbers = #tpu.dot_dimension_numbers<[1], [0], [0], [1], [0, 0, 1, 1], [], []>} : vector<8x256xf32>, vector<256x256xf32>, vector<8x256xf32> -> vector<8x256xf32>
    %c0_48 = arith.constant 0 : index
    %c0_49 = arith.constant 0 : index
    %52 = vector.load %arg19[%c0_48, %c0_49] : memref<1x256xf32, #tpu.memory_space<vmem>>, vector<1x256xf32>
    %53 = vector.broadcast %52 : vector<1x256xf32> to vector<8x256xf32>
    %54 = arith.addf %51, %53 : vector<8x256xf32>
    %cst_50 = arith.constant 0.000000e+00 : f32
    %55 = vector.broadcast %cst_50 : f32 to vector<8x256xf32>
    %56 = arith.maximumf %54, %55 : vector<8x256xf32>
    %c0_51 = arith.constant 0 : index
    %c0_52 = arith.constant 0 : index
    %57 = vector.load %arg20[%c0_51, %c0_52] : memref<256x128xf32, #tpu.memory_space<vmem>>, vector<256x128xf32>
    %cst_53 = arith.constant dense<0.000000e+00> : vector<8x128xf32>
    %58 = tpu.matmul %56, %57, %cst_53 {dimension_numbers = #tpu.dot_dimension_numbers<[1], [0], [0], [1], [0, 0, 1, 1], [], []>} : vector<8x256xf32>, vector<256x128xf32>, vector<8x128xf32> -> vector<8x128xf32>
    %c0_54 = arith.constant 0 : index
    %c0_55 = arith.constant 0 : index
    %59 = vector.load %arg21[%c0_54, %c0_55] : memref<1x128xf32, #tpu.memory_space<vmem>>, vector<1x128xf32>
    %60 = vector.broadcast %59 : vector<1x128xf32> to vector<8x128xf32>
    %61 = arith.addf %58, %60 : vector<8x128xf32>
    %62 = arith.mulf %61, %61 : vector<8x128xf32>
    %cst_56 = arith.constant dense<0.000000e+00> : vector<8xf32>
    %63 = vector.multi_reduction <add>, %62, %cst_56 [1] : vector<8x128xf32> to vector<8xf32>
    %64 = vector.shape_cast %63 : vector<8xf32> to vector<8x1xf32>
    %cst_57 = arith.constant 1.000000e-24 : f32
    %65 = vector.broadcast %cst_57 : f32 to vector<8x1xf32>
    %66 = arith.maximumf %64, %65 : vector<8x1xf32>
    %67 = math.rsqrt %66 : vector<8x1xf32>
    %68 = vector.broadcast %67 : vector<8x1xf32> to vector<8x128xf32>
    %69 = arith.mulf %61, %68 : vector<8x128xf32>
    %c0_58 = arith.constant 0 : index
    %c0_59 = arith.constant 0 : index
    %70 = vector.load %arg22[%c0_58, %c0_59] : memref<8x128xf32, #tpu.memory_space<vmem>>, vector<8x128xf32>
    tpu.vector_store %arg22[%c0_58, %c0_59], %69 {strides = array<i32>} : memref<8x128xf32, #tpu.memory_space<vmem>>, vector<8x128xf32>,
    return
  }
  func.func @transform_0(%arg0: i32) -> (i32, i32) {
    %c0_i32 = arith.constant 0 : i32
    %c0_i32_0 = arith.constant 0 : i32
    return %arg0, %c0_i32 : i32, i32
  }
  func.func @transform_1(%arg0: i32) -> (i32, i32) {
    %c0_i32 = arith.constant 0 : i32
    %c0_i32_0 = arith.constant 0 : i32
    return %arg0, %c0_i32 : i32, i32
  }
  func.func @transform_2(%arg0: i32) -> (i32, i32) {
    %c0_i32 = arith.constant 0 : i32
    %c0_i32_0 = arith.constant 0 : i32
    %c0_i32_1 = arith.constant 0 : i32
    return %c0_i32, %c0_i32_0 : i32, i32
  }
  func.func @transform_3(%arg0: i32) -> (i32, i32) {
    %c0_i32 = arith.constant 0 : i32
    %c0_i32_0 = arith.constant 0 : i32
    %c0_i32_1 = arith.constant 0 : i32
    return %c0_i32, %c0_i32_0 : i32, i32
  }
  func.func @transform_4(%arg0: i32) -> (i32, i32) {
    %c0_i32 = arith.constant 0 : i32
    %c0_i32_0 = arith.constant 0 : i32
    %c0_i32_1 = arith.constant 0 : i32
    return %c0_i32, %c0_i32_0 : i32, i32
  }
  func.func @transform_5(%arg0: i32) -> (i32, i32) {
    %c0_i32 = arith.constant 0 : i32
    %c0_i32_0 = arith.constant 0 : i32
    %c0_i32_1 = arith.constant 0 : i32
    return %c0_i32, %c0_i32_0 : i32, i32
  }
  func.func @transform_6(%arg0: i32) -> (i32, i32) {
    %c0_i32 = arith.constant 0 : i32
    %c0_i32_0 = arith.constant 0 : i32
    %c0_i32_1 = arith.constant 0 : i32
    return %c0_i32, %c0_i32_0 : i32, i32
  }
  func.func @transform_7(%arg0: i32) -> (i32, i32) {
    %c0_i32 = arith.constant 0 : i32
    %c0_i32_0 = arith.constant 0 : i32
    %c0_i32_1 = arith.constant 0 : i32
    return %c0_i32, %c0_i32_0 : i32, i32
  }
  func.func @transform_8(%arg0: i32) -> (i32, i32) {
    %c0_i32 = arith.constant 0 : i32
    %c0_i32_0 = arith.constant 0 : i32
    %c0_i32_1 = arith.constant 0 : i32
    return %c0_i32, %c0_i32_0 : i32, i32
  }
  func.func @transform_9(%arg0: i32) -> (i32, i32) {
    %c0_i32 = arith.constant 0 : i32
    %c0_i32_0 = arith.constant 0 : i32
    %c0_i32_1 = arith.constant 0 : i32
    return %c0_i32, %c0_i32_0 : i32, i32
  }
  func.func @transform_10(%arg0: i32) -> (i32, i32) {
    %c0_i32 = arith.constant 0 : i32
    %c0_i32_0 = arith.constant 0 : i32
    %c0_i32_1 = arith.constant 0 : i32
    return %c0_i32, %c0_i32_0 : i32, i32
  }
  func.func @transform_11(%arg0: i32) -> (i32, i32) {
    %c0_i32 = arith.constant 0 : i32
    %c0_i32_0 = arith.constant 0 : i32
    %c0_i32_1 = arith.constant 0 : i32
    return %c0_i32, %c0_i32_0 : i32, i32
  }
  func.func @transform_12(%arg0: i32) -> (i32, i32) {
    %c0_i32 = arith.constant 0 : i32
    %c0_i32_0 = arith.constant 0 : i32
    %c0_i32_1 = arith.constant 0 : i32
    return %c0_i32, %c0_i32_0 : i32, i32
  }
  func.func @transform_13(%arg0: i32) -> (i32, i32) {
    %c0_i32 = arith.constant 0 : i32
    %c0_i32_0 = arith.constant 0 : i32
    %c0_i32_1 = arith.constant 0 : i32
    return %c0_i32, %c0_i32_0 : i32, i32
  }
  func.func @transform_14(%arg0: i32) -> (i32, i32) {
    %c0_i32 = arith.constant 0 : i32
    %c0_i32_0 = arith.constant 0 : i32
    %c0_i32_1 = arith.constant 0 : i32
    return %c0_i32, %c0_i32_0 : i32, i32
  }
  func.func @transform_15(%arg0: i32) -> (i32, i32) {
    %c0_i32 = arith.constant 0 : i32
    %c0_i32_0 = arith.constant 0 : i32
    %c0_i32_1 = arith.constant 0 : i32
    return %c0_i32, %c0_i32_0 : i32, i32
  }
  func.func @transform_16(%arg0: i32) -> (i32, i32) {
    %c0_i32 = arith.constant 0 : i32
    %c0_i32_0 = arith.constant 0 : i32
    %c0_i32_1 = arith.constant 0 : i32
    return %c0_i32, %c0_i32_0 : i32, i32
  }
  func.func @transform_17(%arg0: i32) -> (i32, i32) {
    %c0_i32 = arith.constant 0 : i32
    %c0_i32_0 = arith.constant 0 : i32
    %c0_i32_1 = arith.constant 0 : i32
    return %c0_i32, %c0_i32_0 : i32, i32
  }
  func.func @transform_18(%arg0: i32) -> (i32, i32) {
    %c0_i32 = arith.constant 0 : i32
    %c0_i32_0 = arith.constant 0 : i32
    %c0_i32_1 = arith.constant 0 : i32
    return %c0_i32, %c0_i32_0 : i32, i32
  }
  func.func @transform_19(%arg0: i32) -> (i32, i32) {
    %c0_i32 = arith.constant 0 : i32
    %c0_i32_0 = arith.constant 0 : i32
    %c0_i32_1 = arith.constant 0 : i32
    return %c0_i32, %c0_i32_0 : i32, i32
  }
  func.func @transform_20(%arg0: i32) -> (i32, i32) {
    %c0_i32 = arith.constant 0 : i32
    %c0_i32_0 = arith.constant 0 : i32
    %c0_i32_1 = arith.constant 0 : i32
    return %c0_i32, %c0_i32_0 : i32, i32
  }
  func.func @transform_21(%arg0: i32) -> (i32, i32) {
    %c0_i32 = arith.constant 0 : i32
    %c0_i32_0 = arith.constant 0 : i32
    return %arg0, %c0_i32 : i32, i32
  }
}

</mosaic_0001>

<bundles_post_ra>
// kernel: three_tower_forward.2
= control target key start
LH: loop header
LB: loop body
LE: loop exit
PB: predicated region body
PF: predicated region fallthrough
CT: control target
= control target key end

     0   :  { %14 = vsyncpa [#allocation3], 0  ;;  %s1095_s0 = inlined_call_operand.vmem [shape: f32[8,512], index: 0, kind: input, shape index: {}]   ;;  %s1096_s1 = inlined_call_operand.hbm [shape: f32[512,128], index: 1, kind: input, shape index: {}]   ;;  %s1097_s2 = inlined_call_operand.hbm [shape: f32[1,128], index: 2, kind: input, shape index: {}]   ;;  %s1098_s3 = inlined_call_operand.hbm [shape: f32[1,128], index: 3, kind: input, shape index: {}]   ;;  %s1099_s4 = inlined_call_operand.hbm [shape: f32[1,128], index: 4, kind: input, shape index: {}]   ;;  %s1100_s5 = inlined_call_operand.hbm [shape: f32[128,128], index: 5, kind: input, shape index: {}]   ;;  %s1101_s6 = inlined_call_operand.hbm [shape: f32[1,128], index: 6, kind: input, shape index: {}]   ;;  %s1102_s7 = inlined_call_operand.hbm [shape: f32[128,128], index: 7, kind: input, shape index: {}]   ;;  %s1103_s8 = inlined_call_operand.hbm [shape: f32[1,128], index: 8, kind: input, shape index: {}]   ;;  %s1104_s9 = inlined_call_operand.vmem [shape: f32[8,128], index: 9, kind: output, shape index: {}]  }
   0x1   :  { %15 = vsyncpa [#allocation5], 0 }
   0x2   :  { %16 = vsyncpa [#allocation8], 0 }
   0x3   :  { %17 = vsyncpa [#allocation11], 0 }
   0x4   :  { %18 = vsyncpa [#allocation14], 0  ;;  %s945_s30 = smov [#allocation4]   ;;  %s946_s11 = smov [#allocation7]  }
   0x5   :  { %s39_s10 = sshll.u32 %s945_s30, 4  ;;  %s59_s12 = sshll.u32 %s946_s11, 4  ;;  %s40_s10 = int_to_ptr.vmem [resolvable:$true] %s39_s10  ;;  %s60_s12 = int_to_ptr.vmem [resolvable:$true] %s59_s12 }
   0x6   :  { %s783_s13 = scalar_lea.vmem %s40_s10, 16  ;;  %s787_s14 = scalar_lea.vmem %s40_s10, 32 }
   0x7   :  { %p784_p0 = scmp.ne.s32.totalorder %s40_s10, %s783_s13  ;;  %p788_p1 = scmp.lt.s32.totalorder %s40_s10, %s40_s10 }
   0x8   :  { %p789_p2 = scmp.lt.s32.totalorder %s787_s14, %s783_s13 }
   0xa   :  { %p790_p3 = por %p789_p2, %p788_p1 }
   0xc   :  { %p791_p4 = pnand %p790_p3, %p784_p0 }
   0xe   :  { %794 = shalt.err (!%p791_p4)
}
   0xf   :  { %42 = dma.hbm_to_vmem [thread:$0]  %s1097_s2, 16, %s40_s10, [#allocation5]  }
  0x10   :  { %s803_s17 = scalar_lea.vmem %s60_s12, 16  ;;  %s807_s18 = scalar_lea.vmem %s60_s12, 32 }
  0x11   :  { %p804_p5 = scmp.ne.s32.totalorder %s60_s12, %s803_s17  ;;  %p808_p6 = scmp.lt.s32.totalorder %s60_s12, %s60_s12 }
  0x12   :  { %p809_p7 = scmp.lt.s32.totalorder %s807_s18, %s803_s17 }
  0x14   :  { %p810_p8 = por %p809_p7, %p808_p6 }
  0x16   :  { %p811_p9 = pnand %p810_p8, %p804_p5 }
  0x18   :  { %814 = shalt.err (!%p811_p9)
}
  0x19   :  { %62 = dma.hbm_to_vmem [thread:$0]  %s1099_s4, 16, %s60_s12, [#allocation8]  }
  0x1a   :  { %s947_s21 = smov [#allocation10]   ;;  %s948_s23 = smov [#allocation2]  }
  0x1b   :  { %s81_s22 = sshll.u32 %s947_s21, 4  ;;  %s26_s24 = sshll.u32 %s948_s23, 4  ;;  %s82_s22 = int_to_ptr.vmem [resolvable:$true] %s81_s22  ;;  %s27_s24 = int_to_ptr.vmem [resolvable:$true] %s26_s24 }
  0x1c   :  { %s823_s25 = scalar_lea.vmem %s82_s22, 16  ;;  %s827_s2 = scalar_lea.vmem %s82_s22, 32 }
  0x1d   :  { %p824_p10 = scmp.ne.s32.totalorder %s82_s22, %s823_s25  ;;  %p828_p11 = scmp.lt.s32.totalorder %s82_s22, %s82_s22 }
  0x1e   :  { %p829_p12 = scmp.lt.s32.totalorder %s827_s2, %s823_s25 }
  0x20   :  { %p830_p13 = por %p829_p12, %p828_p11 }
  0x22   :  { %p831_p0 = pnand %p830_p13, %p824_p10 }
  0x24   :  { %834 = shalt.err (!%p831_p0)
}
  0x25   :  { %84 = dma.hbm_to_vmem [thread:$0]  %s1101_s6, 16, %s82_s22, [#allocation11]  }
  0x26   :  { %s843_s28 = scalar_lea.vmem %s27_s24, 8192  ;;  %p848_p2 = scmp.lt.s32.totalorder %s27_s24, %s27_s24 }
  0x27   :  { %p844_p1 = scmp.ne.s32.totalorder %s27_s24, %s843_s28  ;;  %p849_p3 = scmp.lt.s32.totalorder %s843_s28, %s843_s28 }
  0x29   :  { %p850_p4 = por %p849_p3, %p848_p2 }
  0x2b   :  { %p851_p5 = pnand %p850_p4, %p844_p1 }
  0x2d   :  { %854 = shalt.err (!%p851_p5)
}
  0x2e   :  { %s949_s4 = smov 128   ;;  %s950_s29 = smov 8  }
  0x2f   :  { %32 = dma.hbm_to_vmem [thread:$0]  %s1096_s1, 8192, %s27_s24, [#allocation3], %s949_s4, %s949_s4, %s950_s29  }
  0x30   :  { %s951_s11 = smov [#allocation6]   ;;  %s952_s13 = smov [#allocation9]  }
  0x31   :  { %s49_s12 = sshll.u32 %s951_s11, 4  ;;  %s68_s6 = sshll.u32 %s952_s13, 4  ;;  %s50_s12 = int_to_ptr.vmem [resolvable:$true] %s49_s12  ;;  %s69_s6 = int_to_ptr.vmem [resolvable:$true] %s68_s6 }
  0x32   :  { %s863_s14 = scalar_lea.vmem %s50_s12, 16  ;;  %s867_s15 = scalar_lea.vmem %s50_s12, 32 }
  0x33   :  { %p864_p6 = scmp.ne.s32.totalorder %s50_s12, %s863_s14  ;;  %p868_p7 = scmp.lt.s32.totalorder %s50_s12, %s50_s12 }
  0x34   :  { %p869_p8 = scmp.lt.s32.totalorder %s867_s15, %s863_s14 }
  0x36   :  { %p870_p9 = por %p869_p8, %p868_p7 }
  0x38   :  { %p871_p10 = pnand %p870_p9, %p864_p6 }
  0x3a   :  { %874 = shalt.err (!%p871_p10)
}
  0x3b   :  { %52 = dma.hbm_to_vmem [thread:$0]  %s1098_s3, 16, %s50_s12, [#allocation5]  }
  0x3c   :  { %s883_s18 = scalar_lea.vmem %s69_s6, 2048  ;;  %p888_p12 = scmp.lt.s32.totalorder %s69_s6, %s69_s6 }
  0x3d   :  { %p884_p11 = scmp.ne.s32.totalorder %s69_s6, %s883_s18  ;;  %p889_p13 = scmp.lt.s32.totalorder %s883_s18, %s883_s18 }
  0x3f   :  { %p890_p0 = por %p889_p13, %p888_p12 }
  0x41   :  { %p891_p1 = pnand %p890_p0, %p884_p11 }
  0x43   :  { %894 = shalt.err (!%p891_p1)
}
  0x44   :  { %74 = dma.hbm_to_vmem [thread:$0]  %s1100_s5, 2048, %s69_s6, [#allocation8], %s949_s4, %s949_s4, %s950_s29  }
  0x45   :  { %s953_s20 = smov [#allocation12]   ;;  %s954_s22 = smov [#allocation13]  }
  0x46   :  { %s90_s21 = sshll.u32 %s953_s20, 4  ;;  %s103_s23 = sshll.u32 %s954_s22, 4  ;;  %s91_s21 = int_to_ptr.vmem [resolvable:$true] %s90_s21  ;;  %s104_s23 = int_to_ptr.vmem [resolvable:$true] %s103_s23 }
  0x47   :  { %s903_s3 = scalar_lea.vmem %s91_s21, 2048  ;;  %p908_p3 = scmp.lt.s32.totalorder %s91_s21, %s91_s21 }
  0x48   :  { %p904_p2 = scmp.ne.s32.totalorder %s91_s21, %s903_s3  ;;  %p909_p4 = scmp.lt.s32.totalorder %s903_s3, %s903_s3 }
  0x4a   :  { %p910_p5 = por %p909_p4, %p908_p3 }
  0x4c   :  { %p911_p6 = pnand %p910_p5, %p904_p2 }
  0x4e   :  { %914 = shalt.err (!%p911_p6)
}
  0x4f   :  { %96 = dma.hbm_to_vmem [thread:$0]  %s1102_s7, 2048, %s91_s21, [#allocation11], %s949_s4, %s949_s4, %s950_s29  }
  0x50   :  { %s923_s5 = scalar_lea.vmem %s104_s23, 16  ;;  %s927_s2 = scalar_lea.vmem %s104_s23, 32 }
  0x51   :  { %p924_p7 = scmp.ne.s32.totalorder %s104_s23, %s923_s5  ;;  %p928_p8 = scmp.lt.s32.totalorder %s104_s23, %s104_s23 }
  0x52   :  { %p929_p9 = scmp.lt.s32.totalorder %s927_s2, %s923_s5 }
  0x54   :  { %p930_p10 = por %p929_p9, %p928_p8 }
  0x56   :  { %p931_p11 = pnand %p930_p10, %p924_p7 }
  0x58   :  { %934 = shalt.err (!%p931_p11)
}
  0x59   :  { %106 = dma.hbm_to_vmem [thread:$0]  %s1103_s8, 16, %s104_s23, [#allocation14]  }
  0x5a   :  { %935 = dma.done.wait [#allocation3], 8192  }
  0x5b   :  { %936 = vsyncadd [#allocation3], 4294959104 }
  0x5c   :  { %937 = dma.done.wait [#allocation5], 32  }
  0x5d   :  { %938 = vsyncadd [#allocation5], 4294967264 }
  0x5e   :  { %939 = dma.done.wait [#allocation8], 2064  }
  0x5f   :  { %940 = vsyncadd [#allocation8], 4294965232 }
  0x60   :  { %941 = dma.done.wait [#allocation11], 2064  }
  0x61   :  { %942 = vsyncadd [#allocation11], 4294965232 }
  0x62   :  { %943 = dma.done.wait [#allocation14], 16  }
  0x63   :  { %944 = vsyncadd [#allocation14], 4294967280  ;;  %v166_v0 = vld [vmem:[#allocation2 + $0xf8] sm:$0xff]  ;;  %v165_v4 = vld [vmem:[#allocation2 + $0xf0] sm:$0xff]  ;;  %vm956_vm0 = vmmov 0  }
  0x64   :  { %v198_v1 = vld [vmem:[#allocation2 + $0x1f8] sm:$0xff]  ;;  %585 = vmatprep.subr.mxu0 %v166_v0  ;;  %v197_v5 = vld [vmem:[#allocation2 + $0x1f0] sm:$0xff]  ;;  %v164_v8 = vld [vmem:[#allocation2 + $0xe8] sm:$0xff] }
  0x65   :  { %v150_v2 = vld [vmem:[#allocation2 + $0x78] sm:$0xff]  ;;  %620 = vmatprep.subr.mxu1 %v198_v1  ;;  %v149_v6 = vld [vmem:[#allocation2 + $0x70] sm:$0xff]  ;;  %v196_v9 = vld [vmem:[#allocation2 + $0x1e8] sm:$0xff] }
  0x66   :  { %v182_v3 = vld [vmem:[#allocation2 + $0x178] sm:$0xff]  ;;  %586 = vmatpush3.msra.mxu0 %v150_v2  ;;  %v181_v7 = vld [vmem:[#allocation2 + $0x170] sm:$0xff]  ;;  %v148_v10 = vld [vmem:[#allocation2 + $0x68] sm:$0xff] }
  0x67   :  { %621 = vmatpush3.msra.mxu1 %v182_v3  ;;  %587 = vmatprep.subr.mxu0 %v165_v4  ;;  %v180_v11 = vld [vmem:[#allocation2 + $0x168] sm:$0xff]  ;;  %v163_v12 = vld [vmem:[#allocation2 + $0xe0] sm:$0xff]  ;;  %v162_v16 = vld [vmem:[#allocation2 + $0xd8] sm:$0xff] }
  0x68   :  { %622 = vmatprep.subr.mxu1 %v197_v5  ;;  %588 = vmatpush3.msra.mxu0 %v149_v6  ;;  %v195_v13 = vld [vmem:[#allocation2 + $0x1e0] sm:$0xff]  ;;  %v194_v17 = vld [vmem:[#allocation2 + $0x1d8] sm:$0xff]  ;;  %v161_v20 = vld [vmem:[#allocation2 + $0xd0] sm:$0xff] }
  0x69   :  { %623 = vmatpush3.msra.mxu1 %v181_v7  ;;  %589 = vmatprep.subr.mxu0 %v164_v8  ;;  %v147_v14 = vld [vmem:[#allocation2 + $0x60] sm:$0xff]  ;;  %v146_v18 = vld [vmem:[#allocation2 + $0x58] sm:$0xff]  ;;  %v193_v21 = vld [vmem:[#allocation2 + $0x1d0] sm:$0xff] }
  0x6a   :  { %624 = vmatprep.subr.mxu1 %v196_v9  ;;  %v179_v15 = vld [vmem:[#allocation2 + $0x160] sm:$0xff]  ;;  %590 = vmatpush3.msra.mxu0 %v148_v10  ;;  %v178_v19 = vld [vmem:[#allocation2 + $0x158] sm:$0xff]  ;;  %v145_v22 = vld [vmem:[#allocation2 + $0x50] sm:$0xff] }
  0x6b   :  { %625 = vmatpush3.msra.mxu1 %v180_v11  ;;  %591 = vmatprep.subr.mxu0 %v163_v12  ;;  %v177_v23 = vld [vmem:[#allocation2 + $0x150] sm:$0xff]  ;;  %v160_v24 = vld [vmem:[#allocation2 + $0xc8] sm:$0xff]  ;;  %v159_v28 = vld [vmem:[#allocation2 + $0xc0] sm:$0xff] }
  0x6c   :  { %626 = vmatprep.subr.mxu1 %v195_v13  ;;  %592 = vmatpush3.msra.mxu0 %v147_v14  ;;  %v192_v25 = vld [vmem:[#allocation2 + $0x1c8] sm:$0xff]  ;;  %v191_v29 = vld [vmem:[#allocation2 + $0x1c0] sm:$0xff]  ;;  %v158_v32 = vld [vmem:[#allocation2 + $0xb8] sm:$0xff]  ;;  %v955_v14 = vmov 0.0  }
  0x6d   :  { %627 = vmatpush3.msra.mxu1 %v179_v15  ;;  %593 = vmatprep.subr.mxu0 %v162_v16  ;;  %v144_v26 = vld [vmem:[#allocation2 + $0x48] sm:$0xff]  ;;  %v143_v30 = vld [vmem:[#allocation2 + $0x40] sm:$0xff]  ;;  %v190_v33 = vld [vmem:[#allocation2 + $0x1b8] sm:$0xff] }
  0x6e   :  { %628 = vmatprep.subr.mxu1 %v194_v17  ;;  %594 = vmatpush3.msra.mxu0 %v146_v18  ;;  %v176_v27 = vld [vmem:[#allocation2 + $0x148] sm:$0xff]  ;;  %v175_v31 = vld [vmem:[#allocation2 + $0x140] sm:$0xff]  ;;  %v142_v34 = vld [vmem:[#allocation2 + $0x38] sm:$0xff] }
  0x6f   :  { %629 = vmatpush3.msra.mxu1 %v178_v19  ;;  %595 = vmatprep.subr.mxu0 %v161_v20  ;;  %v174_v35 = vld [vmem:[#allocation2 + $0x138] sm:$0xff]  ;;  %v157_v36 = vld [vmem:[#allocation2 + $0xb0] sm:$0xff]  ;;  %v156_v40 = vld [vmem:[#allocation2 + $0xa8] sm:$0xff] }
  0x70   :  { %630 = vmatprep.subr.mxu1 %v193_v21  ;;  %596 = vmatpush3.msra.mxu0 %v145_v22  ;;  %v189_v37 = vld [vmem:[#allocation2 + $0x1b0] sm:$0xff]  ;;  %v188_v41 = vld [vmem:[#allocation2 + $0x1a8] sm:$0xff]  ;;  %v155_v44 = vld [vmem:[#allocation2 + $0xa0] sm:$0xff] }
  0x71   :  { %631 = vmatpush3.msra.mxu1 %v177_v23  ;;  %597 = vmatprep.subr.mxu0 %v160_v24  ;;  %v141_v38 = vld [vmem:[#allocation2 + $0x30] sm:$0xff]  ;;  %v140_v42 = vld [vmem:[#allocation2 + $0x28] sm:$0xff]  ;;  %v187_v45 = vld [vmem:[#allocation2 + $0x1a0] sm:$0xff] }
  0x72   :  { %632 = vmatprep.subr.mxu1 %v192_v25  ;;  %598 = vmatpush3.msra.mxu0 %v144_v26  ;;  %v173_v39 = vld [vmem:[#allocation2 + $0x130] sm:$0xff]  ;;  %v172_v43 = vld [vmem:[#allocation2 + $0x128] sm:$0xff]  ;;  %v139_v46 = vld [vmem:[#allocation2 + $0x20] sm:$0xff] }
  0x73   :  { %633 = vmatpush3.msra.mxu1 %v176_v27  ;;  %599 = vmatprep.subr.mxu0 %v159_v28  ;;  %v171_v47 = vld [vmem:[#allocation2 + $0x120] sm:$0xff]  ;;  %v154_v48 = vld [vmem:[#allocation2 + $0x98] sm:$0xff]  ;;  %v153_v52 = vld [vmem:[#allocation2 + $0x90] sm:$0xff] }
  0x74   :  { %634 = vmatprep.subr.mxu1 %v191_v29  ;;  %600 = vmatpush3.msra.mxu0 %v143_v30  ;;  %v186_v49 = vld [vmem:[#allocation2 + $0x198] sm:$0xff]  ;;  %v185_v53 = vld [vmem:[#allocation2 + $0x190] sm:$0xff]  ;;  %v152_v56 = vld [vmem:[#allocation2 + $0x88] sm:$0xff] }
  0x75   :  { %635 = vmatpush3.msra.mxu1 %v175_v31  ;;  %601 = vmatprep.subr.mxu0 %v158_v32  ;;  %v138_v50 = vld [vmem:[#allocation2 + $0x18] sm:$0xff]  ;;  %v137_v54 = vld [vmem:[#allocation2 + $0x10] sm:$0xff]  ;;  %v184_v57 = vld [vmem:[#allocation2 + $0x188] sm:$0xff] }
  0x76   :  { %636 = vmatprep.subr.mxu1 %v190_v33  ;;  %602 = vmatpush3.msra.mxu0 %v142_v34  ;;  %v170_v51 = vld [vmem:[#allocation2 + $0x118] sm:$0xff]  ;;  %v169_v55 = vld [vmem:[#allocation2 + $0x110] sm:$0xff]  ;;  %v136_v58 = vld [vmem:[#allocation2 + $0x8] sm:$0xff] }
  0x77   :  { %637 = vmatpush3.msra.mxu1 %v174_v35  ;;  %603 = vmatprep.subr.mxu0 %v157_v36  ;;  %v168_v59 = vld [vmem:[#allocation2 + $0x108] sm:$0xff]  ;;  %v151_v60 = vld [vmem:[#allocation2 + $0x80] sm:$0xff]  ;;  %v134_v1 = vld [vmem:[%s1095_s0 + $0x18] sm:$0xff] }
  0x78   :  { %638 = vmatprep.subr.mxu1 %v189_v37  ;;  %604 = vmatpush3.msra.mxu0 %v141_v38  ;;  %v183_v61 = vld [vmem:[#allocation2 + $0x180] sm:$0xff]  ;;  %v132_v63 = vld [vmem:[%s1095_s0 + $0x8] sm:$0xff]  ;;  %v133_v3 = vld [vmem:[%s1095_s0 + $0x10] sm:$0xff] }
  0x79   :  { %639 = vmatpush3.msra.mxu1 %v173_v39  ;;  %605 = vmatprep.subr.mxu0 %v156_v40  ;;  %v135_v62 = vld [vmem:[#allocation2] sm:$0xff]  ;;  %v391_v16 = vld [vmem:[#allocation9 + $0x70] sm:$0xff]  ;;  %v390_v17 = vld [vmem:[#allocation9 + $0x68] sm:$0xff] }
  0x7a   :  { %640 = vmatprep.subr.mxu1 %v188_v41  ;;  %606 = vmatpush3.msra.mxu0 %v140_v42  ;;  %v167_v0 = vld [vmem:[#allocation2 + $0x100] sm:$0xff]  ;;  %v387_v20 = vld [vmem:[#allocation9 + $0x50] sm:$0xff]  ;;  %v386_v21 = vld [vmem:[#allocation9 + $0x48] sm:$0xff] }
  0x7b   :  { %641 = vmatpush3.msra.mxu1 %v172_v43  ;;  %607 = vmatprep.subr.mxu0 %v155_v44  ;;  %v131_v2 = vld [vmem:[%s1095_s0] sm:$0xff]  ;;  %v383_v24 = vld [vmem:[#allocation9 + $0x30] sm:$0xff]  ;;  %v382_v25 = vld [vmem:[#allocation9 + $0x28] sm:$0xff] }
  0x7c   :  { %642 = vmatprep.subr.mxu1 %v187_v45  ;;  %608 = vmatpush3.msra.mxu0 %v139_v46  ;;  %v580_v6 = vld [vmem:[#allocation4] ss:$0 sm:$0xff]  ;;  %v389_v18 = vld [vmem:[#allocation9 + $0x60] sm:$0xff]  ;;  %v379_v28 = vld [vmem:[#allocation9 + $0x10] sm:$0xff] }
  0x7d   :  { %643 = vmatpush3.msra.mxu1 %v171_v47  ;;  %609 = vmatprep.subr.mxu0 %v154_v48  ;;  %v392_v15 = vld [vmem:[#allocation9 + $0x78] sm:$0xff]  ;;  %v385_v22 = vld [vmem:[#allocation9 + $0x40] sm:$0xff]  ;;  %v378_v29 = vld [vmem:[#allocation9 + $0x8] sm:$0xff] }
  0x7e   :  { %644 = vmatprep.subr.mxu1 %v186_v49  ;;  %610 = vmatpush3.msra.mxu0 %v138_v50  ;;  %v388_v19 = vld [vmem:[#allocation9 + $0x58] sm:$0xff]  ;;  %v381_v26 = vld [vmem:[#allocation9 + $0x20] sm:$0xff]  ;;  %v484_v33 = vld [vmem:[#allocation12 + $0x68] sm:$0xff] }
  0x7f   :  { %645 = vmatpush3.msra.mxu1 %v170_v51  ;;  %611 = vmatprep.subr.mxu0 %v153_v52  ;;  %v384_v23 = vld [vmem:[#allocation9 + $0x38] sm:$0xff]  ;;  %v377_v30 = vld [vmem:[#allocation9] sm:$0xff]  ;;  %v480_v37 = vld [vmem:[#allocation12 + $0x48] sm:$0xff] }
  0x80   :  { %646 = vmatprep.subr.mxu1 %v185_v53  ;;  %612 = vmatpush3.msra.mxu0 %v137_v54  ;;  %v380_v27 = vld [vmem:[#allocation9 + $0x18] sm:$0xff]  ;;  %v483_v34 = vld [vmem:[#allocation12 + $0x60] sm:$0xff]  ;;  %v476_v41 = vld [vmem:[#allocation12 + $0x28] sm:$0xff] }
  0x81   :  { %647 = vmatpush3.msra.mxu1 %v169_v55  ;;  %613 = vmatprep.subr.mxu0 %v152_v56  ;;  %v486_v31 = vld [vmem:[#allocation12 + $0x78] sm:$0xff]  ;;  %v485_v32 = vld [vmem:[#allocation12 + $0x70] sm:$0xff]  ;;  %v479_v38 = vld [vmem:[#allocation12 + $0x40] sm:$0xff] }
  0x82   :  { %648 = vmatprep.subr.mxu1 %v184_v57  ;;  %614 = vmatpush3.msra.mxu0 %v136_v58  ;;  %v482_v35 = vld [vmem:[#allocation12 + $0x58] sm:$0xff]  ;;  %v481_v36 = vld [vmem:[#allocation12 + $0x50] sm:$0xff]  ;;  %v475_v42 = vld [vmem:[#allocation12 + $0x20] sm:$0xff] }
  0x83   :  { %649 = vmatpush3.msra.mxu1 %v168_v59  ;;  %615 = vmatprep.subr.mxu0 %v151_v60  ;;  %v478_v39 = vld [vmem:[#allocation12 + $0x38] sm:$0xff]  ;;  %v477_v40 = vld [vmem:[#allocation12 + $0x30] sm:$0xff]  ;;  %v472_v60 = vld [vmem:[#allocation12 + $0x8] sm:$0xff] }
  0x84   :  { %650 = vmatprep.subr.mxu1 %v183_v61  ;;  %616 = vmatpush3.msra.mxu0 %v135_v62  ;;  %v474_v43 = vld [vmem:[#allocation12 + $0x18] sm:$0xff]  ;;  %v473_v59 = vld [vmem:[#allocation12 + $0x10] sm:$0xff]  ;;  %v471_v61 = vld [vmem:[#allocation12] sm:$0xff] }
  0x85   :  { %270 = vmatprep.mubr.f32.mxu0 %v132_v63  ;;  %651 = vmatpush3.msra.mxu1 %v167_v0  ;;  %v581_v53 = vld [vmem:[#allocation6] ss:$0 sm:$0xff]  ;;  %v582_v55 = vld [vmem:[#allocation7] ss:$0 sm:$0xff]  ;;  %v583_v62 = vld [vmem:[#allocation10] ss:$0 sm:$0xff] }
  0x86   :  { %340 = vmatprep.mubr.f32.mxu1 %v134_v1  ;;  %271 = vmatmul.mubr.f32.vlgmr.msra.gmra.mxu0 %v131_v2 }
  0x87   :  { %341 = vmatmul.mubr.f32.vlgmr.msra.gmra.mxu1 %v133_v3  ;;  %689 = vmatprep.subr.mxu0 %v955_v14  ;;  %v584_v3 = vld [vmem:[#allocation13] ss:$0 sm:$0xff] }
  0x88   :  { %724 = vmatprep.subr.mxu1 %v955_v14  ;;  %690 = vmatpush3.msra.mxu0 %v392_v15 }
  0x89   :  { %691 = vmatprep.subr.mxu0 %v955_v14  ;;  %721 = vmatprep.mubr.msk.f32.mxu0 %vm956_vm0, %v955_v14 }
  0x8a   :  { %692 = vmatpush3.msra.mxu0 %v391_v16  ;;  %756 = vmatprep.mubr.msk.f32.mxu1 %vm956_vm0, %v955_v14 }
  0x8b   :  { %693 = vmatprep.subr.mxu0 %v955_v14  ;;  %725 = vmatpush3.msra.mxu1 %v486_v31 }
  0x8c   :  { %694 = vmatpush3.msra.mxu0 %v390_v17  ;;  %726 = vmatprep.subr.mxu1 %v955_v14 }
  0x8d   :  { %695 = vmatprep.subr.mxu0 %v955_v14  ;;  %727 = vmatpush3.msra.mxu1 %v485_v32 }
  0x8e   :  { %696 = vmatpush3.msra.mxu0 %v389_v18  ;;  %728 = vmatprep.subr.mxu1 %v955_v14 }
  0x8f   :  { %697 = vmatprep.subr.mxu0 %v955_v14  ;;  %729 = vmatpush3.msra.mxu1 %v484_v33 }
  0x90   :  { %698 = vmatpush3.msra.mxu0 %v388_v19  ;;  %730 = vmatprep.subr.mxu1 %v955_v14 }
  0x91   :  { %699 = vmatprep.subr.mxu0 %v955_v14  ;;  %731 = vmatpush3.msra.mxu1 %v483_v34 }
  0x92   :  { %700 = vmatpush3.msra.mxu0 %v387_v20  ;;  %732 = vmatprep.subr.mxu1 %v955_v14 }
  0x93   :  { %701 = vmatprep.subr.mxu0 %v955_v14  ;;  %733 = vmatpush3.msra.mxu1 %v482_v35 }
  0x94   :  { %702 = vmatpush3.msra.mxu0 %v386_v21  ;;  %734 = vmatprep.subr.mxu1 %v955_v14 }
  0x95   :  { %703 = vmatprep.subr.mxu0 %v955_v14  ;;  %735 = vmatpush3.msra.mxu1 %v481_v36 }
  0x96   :  { %704 = vmatpush3.msra.mxu0 %v385_v22  ;;  %736 = vmatprep.subr.mxu1 %v955_v14 }
  0x97   :  { %705 = vmatprep.subr.mxu0 %v955_v14  ;;  %737 = vmatpush3.msra.mxu1 %v480_v37 }
  0x98   :  { %706 = vmatpush3.msra.mxu0 %v384_v23  ;;  %738 = vmatprep.subr.mxu1 %v955_v14 }
  0x99   :  { %707 = vmatprep.subr.mxu0 %v955_v14  ;;  %739 = vmatpush3.msra.mxu1 %v479_v38 }
  0x9a   :  { %708 = vmatpush3.msra.mxu0 %v383_v24  ;;  %740 = vmatprep.subr.mxu1 %v955_v14 }
  0x9b   :  { %709 = vmatprep.subr.mxu0 %v955_v14  ;;  %741 = vmatpush3.msra.mxu1 %v478_v39 }
  0x9c   :  { %710 = vmatpush3.msra.mxu0 %v382_v25  ;;  %742 = vmatprep.subr.mxu1 %v955_v14 }
  0x9d   :  { %711 = vmatprep.subr.mxu0 %v955_v14  ;;  %743 = vmatpush3.msra.mxu1 %v477_v40 }
  0x9e   :  { %712 = vmatpush3.msra.mxu0 %v381_v26  ;;  %744 = vmatprep.subr.mxu1 %v955_v14 }
  0x9f   :  { %713 = vmatprep.subr.mxu0 %v955_v14  ;;  %745 = vmatpush3.msra.mxu1 %v476_v41 }
  0xa0   :  { %714 = vmatpush3.msra.mxu0 %v380_v27  ;;  %746 = vmatprep.subr.mxu1 %v955_v14 }
  0xa1   :  { %715 = vmatprep.subr.mxu0 %v955_v14  ;;  %747 = vmatpush3.msra.mxu1 %v475_v42 }
  0xa2   :  { %716 = vmatpush3.msra.mxu0 %v379_v28  ;;  %748 = vmatprep.subr.mxu1 %v955_v14 }
  0xa3   :  { %717 = vmatprep.subr.mxu0 %v955_v14  ;;  %749 = vmatpush3.msra.mxu1 %v474_v43 }
  0xa4   :  { %718 = vmatpush3.msra.mxu0 %v378_v29  ;;  %750 = vmatprep.subr.mxu1 %v955_v14 }
  0xa5   :  { %719 = vmatprep.subr.mxu0 %v955_v14  ;;  %751 = vmatpush3.msra.mxu1 %v473_v59 }
  0xa6   :  { %720 = vmatpush3.msra.mxu0 %v377_v30  ;;  %752 = vmatprep.subr.mxu1 %v955_v14 }
  0xa7   :  { %753 = vmatpush3.msra.mxu1 %v472_v60 }
  0xa8   :  { %754 = vmatprep.subr.mxu1 %v955_v14 }
  0xa9   :  { %755 = vmatpush3.msra.mxu1 %v471_v61 }
 0x146   :  { %v617_v4 = vpop.f32.mrf.mxu0 }
 0x147   :  { %v652_v5 = vpop.f32.mrf.mxu1 }
 0x148   :  { %v618_v7 = vpop.f32.mrf.mxu0 }
 0x149   :  { %v653_v8 = vpop.f32.mrf.mxu1  ;;  %v619_v9 = vadd.f32 %v618_v7, %v617_v4 }
 0x14a   :  { %v654_v11 = vadd.f32 %v653_v8, %v652_v5 }
 0x14b   :  { %v273_v10 = vadd.f32 %v619_v9, %v580_v6 }
 0x14d   :  { %v1052_v12 = vadd.f32 %v654_v11, %v273_v10 }
 0x14f   :  { %346 = vadd.xlane.f32.xlu0 %v1052_v12  ;;  %v350_v13 = vmul.f32 %v1052_v12, %v1052_v12 }
 0x153   :  { %351 = vadd.xlane.f32.xlu0 %v350_v13 }
 0x1d8   :  { %v347_v44 = vpop.xlane.xlu0 %346 }
 0x1d9   :  { %v349_v45 = vmul.f32 0.0078125, %v347_v44 }
 0x1db   :  { %v354_v47 = vmul.f32 %v349_v45, %v349_v45  ;;  %v356_v51 = vsub.f32 %v1052_v12, %v349_v45 }
 0x1dc   :  { %v352_v46 = vpop.xlane.xlu0 %351 }
 0x1dd   :  { %v353_v48 = vmul.f32 0.0078125, %v352_v46 }
 0x1df   :  { %v355_v49 = vsub.f32 %v353_v48, %v354_v47 }
 0x1e1   :  { %v357_v50 = vadd.f32 1e-05, %v355_v49 }
 0x1e3   :  { %771 = vrsqrt.f32 %v357_v50 }
 0x1f0   :  { %v772_v52 = vpop.eup %771 }
 0x1f1   :  { %v359_v54 = vmul.f32 %v772_v52, %v356_v51 }
 0x1f3   :  { %v367_v56 = vmul.f32 %v581_v53, %v359_v54 }
 0x1f5   :  { %v375_v57 = vadd.f32 %v582_v55, %v367_v56 }
 0x1f7   :  { %v376_v58 = vmax.f32 %v375_v57, 0.0 }
 0x1f9   :  { %722 = vmatmul.mubr.f32.vlgmr.msra.gmra.mxu0 %v376_v58 }
 0x2b9   :  { %v466_v63 = vpop.f32.mrf.mxu0 }
 0x2ba   :  { %v467_v0 = vadd.f32 %v583_v62, %v466_v63 }
 0x2bb   :  { %v723_v1 = vpop.f32.mrf.mxu0 }
 0x2bc   :  { %v470_v2 = vmax.f32 %v467_v0, 0.0 }
 0x2be   :  { %757 = vmatmul.mubr.f32.vlgmr.msra.gmra.mxu1 %v470_v2 }
 0x37e   :  { %v560_v4 = vpop.f32.mrf.mxu1 }
 0x37f   :  { %v561_v5 = vadd.f32 %v584_v3, %v560_v4 }
 0x380   :  { %v758_v6 = vpop.f32.mrf.mxu1 }
 0x381   :  { %v564_v7 = vmul.f32 %v561_v5, %v561_v5 }
 0x383   :  { %565 = vadd.xlane.f32.xlu1 %v564_v7 }
 0x40c   :  { %v566_v8 = vpop.xlane.xlu1 %565 }
 0x40d   :  { %v567_v9 = vmax.f32 %v566_v8, 1e-24 }
 0x40f   :  { %773 = vrsqrt.f32 %v567_v9 }
 0x41c   :  { %v774_v10 = vpop.eup %773 }
 0x41d   :  { %v569_v11 = vmul.f32 %v774_v10, %v561_v5 }
 0x41f   :  { %570 = vst [vmem:[%s1104_s9] sm:$0xff] %v569_v11 }
 0x420   :  { %575 = vsyncpa [#allocation3], 1 }
 0x421   :  { %576 = vsyncpa [#allocation5], 1 }
 0x422   :  { %577 = vsyncpa [#allocation8], 1 }
 0x423   :  { %578 = vsyncpa [#allocation11], 1 }
 0x424   :  { %579 = vsyncpa [#allocation14], 1 }

// kernel: three_tower_forward.3
= control target key start
LH: loop header
LB: loop body
LE: loop exit
PB: predicated region body
PF: predicated region fallthrough
CT: control target
= control target key end

     0   :  { %s3359_s0 = inlined_call_operand.vmem [shape: f32[8,512], index: 0, kind: input, shape index: {}]   ;;  %s3360_s1 = inlined_call_operand.vmem [shape: f32[8,512], index: 1, kind: input, shape index: {}]   ;;  %s3361_s2 = inlined_call_operand.vmem [shape: f32[512,128], index: 2, kind: input, shape index: {}]   ;;  %s3362_s3 = inlined_call_operand.hbm [shape: f32[1,128], index: 3, kind: input, shape index: {}]   ;;  %s3363_s4 = inlined_call_operand.hbm [shape: f32[128,128], index: 4, kind: input, shape index: {}]   ;;  %s3364_s5 = inlined_call_operand.hbm [shape: f32[1,128], index: 5, kind: input, shape index: {}]   ;;  %s3365_s6 = inlined_call_operand.hbm [shape: f32[128,128], index: 6, kind: input, shape index: {}]   ;;  %s3366_s7 = inlined_call_operand.hbm [shape: f32[1,128], index: 7, kind: input, shape index: {}]   ;;  %s3367_s8 = inlined_call_operand.vmem [shape: f32[512,128], index: 8, kind: input, shape index: {}]   ;;  %s3368_s9 = inlined_call_operand.hbm [shape: f32[1,128], index: 9, kind: input, shape index: {}]   ;;  %s3369_s10 = inlined_call_operand.hbm [shape: f32[128,128], index: 10, kind: input, shape index: {}]   ;;  %s3370_s11 = inlined_call_operand.hbm [shape: f32[1,128], index: 11, kind: input, shape index: {}]   ;;  %s3371_s12 = inlined_call_operand.hbm [shape: f32[128,128], index: 12, kind: input, shape index: {}]   ;;  %s3372_s13 = inlined_call_operand.hbm [shape: f32[1,128], index: 13, kind: input, shape index: {}]   ;;  %s3373_s14 = inlined_call_operand.vmem [shape: f32[128,256], index: 14, kind: input, shape index: {}]   ;;  %s3374_s15 = inlined_call_operand.vmem [shape: f32[128,256], index: 15, kind: input, shape index: {}]   ;;  %s3375_s16 = inlined_call_operand.hbm [shape: f32[1,256], index: 16, kind: input, shape index: {}]   ;;  %s3376_s17 = inlined_call_operand.vmem [shape: f32[256,256], index: 17, kind: input, shape index: {}]   ;;  %s3377_s18 = inlined_call_operand.hbm [shape: f32[1,256], index: 18, kind: input, shape index: {}]   ;;  %s3378_s19 = inlined_call_operand.vmem [shape: f32[256,128], index: 19, kind: input, shape index: {}]   ;;  %s3379_s20 = inlined_call_operand.hbm [shape: f32[1,128], index: 20, kind: input, shape index: {}]   ;;  %s3380_s21 = inlined_call_operand.vmem [shape: f32[8,128], index: 21, kind: output, shape index: {}]  }
   0x1   :  { %3384 = sst [smem:[#allocation29_spill]] %s3359_s0 }
   0x2   :  { %3385 = sst [smem:[#allocation30_spill]] %s3360_s1 }
   0x3   :  { %3386 = sst [smem:[#allocation31_spill]] %s3361_s2 }
   0x4   :  { %3387 = sst [smem:[#allocation32_spill]] %s3362_s3 }
   0x5   :  { %3388 = sst [smem:[#allocation33_spill]] %s3363_s4 }
   0x6   :  { %3389 = sst [smem:[#allocation34_spill]] %s3364_s5 }
   0x7   :  { %26 = vsyncpa [#allocation3], 0 }
   0x8   :  { %27 = vsyncpa [#allocation5], 0 }
   0x9   :  { %28 = vsyncpa [#allocation8], 0 }
   0xa   :  { %29 = vsyncpa [#allocation11], 0 }
   0xb   :  { %30 = vsyncpa [#allocation14], 0 }
   0xc   :  { %31 = vsyncpa [#allocation17], 0 }
   0xd   :  { %32 = vsyncpa [#allocation20], 0  ;;  %s2213_s2 = smov [#allocation4]  }
   0xe   :  { %s54_s25 = sshll.u32 %s2213_s2, 4  ;;  %s55_s25 = int_to_ptr.vmem [resolvable:$true] %s54_s25 }
   0xf   :  { %s1947_s26 = scalar_lea.vmem %s55_s25, 2048  ;;  %p1952_p1 = scmp.lt.s32.totalorder %s55_s25, %s55_s25 }
  0x10   :  { %p1948_p0 = scmp.ne.s32.totalorder %s55_s25, %s1947_s26  ;;  %p1953_p2 = scmp.lt.s32.totalorder %s1947_s26, %s1947_s26 }
  0x12   :  { %p1954_p3 = por %p1953_p2, %p1952_p1 }
  0x14   :  { %p1955_p4 = pnand %p1954_p3, %p1948_p0 }
  0x16   :  { %1958 = shalt.err (!%p1955_p4)
}
  0x17   :  { %s2214_s27 = smov 128   ;;  %s2215_s3 = smov 8  }
  0x18   :  { %s3390_s0 = sld [smem:[#allocation33_spill]]  ;;  %s2216_s4 = smov [#allocation7]  }
  0x19   :  { %s76_s30 = sshll.u32 %s2216_s4, 4  ;;  %s2217_s5 = smov [#allocation10]   ;;  %s77_s30 = int_to_ptr.vmem [resolvable:$true] %s76_s30 }
  0x1a   :  { %s101_s22 = sshll.u32 %s2217_s5, 4  ;;  %s1967_s23 = scalar_lea.vmem %s77_s30, 2048  ;;  %s102_s22 = int_to_ptr.vmem [resolvable:$true] %s101_s22 }
  0x1b   :  { %p1968_p5 = scmp.ne.s32.totalorder %s77_s30, %s1967_s23  ;;  %p1972_p6 = scmp.lt.s32.totalorder %s77_s30, %s77_s30 }
  0x1c   :  { %p1973_p7 = scmp.lt.s32.totalorder %s1967_s23, %s1967_s23 }
  0x1e   :  { %60 = dma.hbm_to_vmem [thread:$0]  %s3390_s0, 2048, %s55_s25, [#allocation5], %s2214_s27, %s2214_s27, %s2215_s3  }
  0x1f   :  { %p1974_p8 = por %p1973_p7, %p1972_p6 }
  0x21   :  { %p1975_p9 = pnand %p1974_p8, %p1968_p5 }
  0x23   :  { %1978 = shalt.err (!%p1975_p9)
}
  0x24   :  { %82 = dma.hbm_to_vmem [thread:$0]  %s3365_s6, 2048, %s77_s30, [#allocation8], %s2214_s27, %s2214_s27, %s2215_s3  }
  0x25   :  { %s1987_s2 = scalar_lea.vmem %s102_s22, 16  ;;  %s1991_s25 = scalar_lea.vmem %s102_s22, 32 }
  0x26   :  { %p1988_p10 = scmp.ne.s32.totalorder %s102_s22, %s1987_s2  ;;  %p1992_p11 = scmp.lt.s32.totalorder %s102_s22, %s102_s22 }
  0x27   :  { %p1993_p12 = scmp.lt.s32.totalorder %s1991_s25, %s1987_s2 }
  0x29   :  { %p1994_p13 = por %p1993_p12, %p1992_p11 }
  0x2b   :  { %p1995_p0 = pnand %p1994_p13, %p1988_p10 }
  0x2d   :  { %1998 = shalt.err (!%p1995_p0)
}
  0x2e   :  { %104 = dma.hbm_to_vmem [thread:$0]  %s3368_s9, 16, %s102_s22, [#allocation11]  }
  0x2f   :  { %s2218_s29 = smov [#allocation13]   ;;  %s2219_s4 = smov [#allocation16]  }
  0x30   :  { %s123_s0 = sshll.u32 %s2218_s29, 4  ;;  %s145_s5 = sshll.u32 %s2219_s4, 4  ;;  %s124_s0 = int_to_ptr.vmem [resolvable:$true] %s123_s0  ;;  %s146_s5 = int_to_ptr.vmem [resolvable:$true] %s145_s5 }
  0x31   :  { %s2007_s23 = scalar_lea.vmem %s124_s0, 16  ;;  %s2011_s6 = scalar_lea.vmem %s124_s0, 32 }
  0x32   :  { %p2008_p1 = scmp.ne.s32.totalorder %s124_s0, %s2007_s23  ;;  %p2012_p2 = scmp.lt.s32.totalorder %s124_s0, %s124_s0 }
  0x33   :  { %p2013_p3 = scmp.lt.s32.totalorder %s2011_s6, %s2007_s23 }
  0x35   :  { %p2014_p4 = por %p2013_p3, %p2012_p2 }
  0x37   :  { %p2015_p5 = pnand %p2014_p4, %p2008_p1 }
  0x39   :  { %2018 = shalt.err (!%p2015_p5)
}
  0x3a   :  { %126 = dma.hbm_to_vmem [thread:$0]  %s3370_s11, 16, %s124_s0, [#allocation14]  }
  0x3b   :  { %s2027_s24 = scalar_lea.vmem %s146_s5, 16  ;;  %s2031_s9 = scalar_lea.vmem %s146_s5, 32 }
  0x3c   :  { %p2028_p6 = scmp.ne.s32.totalorder %s146_s5, %s2027_s24  ;;  %p2032_p7 = scmp.lt.s32.totalorder %s146_s5, %s146_s5 }
  0x3d   :  { %p2033_p8 = scmp.lt.s32.totalorder %s2031_s9, %s2027_s24 }
  0x3f   :  { %p2034_p9 = por %p2033_p8, %p2032_p7 }
  0x41   :  { %p2035_p10 = pnand %p2034_p9, %p2028_p6 }
  0x43   :  { %2038 = shalt.err (!%p2035_p10)
}
  0x44   :  { %148 = dma.hbm_to_vmem [thread:$0]  %s3372_s13, 16, %s146_s5, [#allocation17]  }
  0x45   :  { %s2220_s25 = smov [#allocation19]   ;;  %s2221_s28 = smov [#allocation2]  }
  0x46   :  { %s171_s26 = sshll.u32 %s2220_s25, 4  ;;  %s45_s29 = sshll.u32 %s2221_s28, 4  ;;  %s172_s26 = int_to_ptr.vmem [resolvable:$true] %s171_s26  ;;  %s46_s29 = int_to_ptr.vmem [resolvable:$true] %s45_s29 }
  0x47   :  { %s2047_s4 = scalar_lea.vmem %s172_s26, 32  ;;  %p2052_p12 = scmp.lt.s32.totalorder %s172_s26, %s172_s26 }
  0x48   :  { %p2048_p11 = scmp.ne.s32.totalorder %s172_s26, %s2047_s4  ;;  %p2053_p13 = scmp.lt.s32.totalorder %s2047_s4, %s2047_s4 }
  0x4a   :  { %p2054_p0 = por %p2053_p13, %p2052_p12 }
  0x4c   :  { %p2055_p1 = pnand %p2054_p0, %p2048_p11 }
  0x4e   :  { %2058 = shalt.err (!%p2055_p1)
}
  0x4f   :  { %174 = dma.hbm_to_vmem [thread:$0]  %s3377_s18, 32, %s172_s26, [#allocation20]  }
  0x50   :  { %s2067_s23 = scalar_lea.vmem %s46_s29, 16  ;;  %s2071_s13 = scalar_lea.vmem %s46_s29, 32 }
  0x51   :  { %p2068_p2 = scmp.ne.s32.totalorder %s46_s29, %s2067_s23  ;;  %p2072_p3 = scmp.lt.s32.totalorder %s46_s29, %s46_s29 }
  0x52   :  { %p2073_p4 = scmp.lt.s32.totalorder %s2071_s13, %s2067_s23 }
  0x54   :  { %p2074_p5 = por %p2073_p4, %p2072_p3 }
  0x56   :  { %p2075_p6 = pnand %p2074_p5, %p2068_p2 }
  0x58   :  { %2078 = shalt.err (!%p2075_p6)
}
  0x59   :  { %s3391_s30 = sld [smem:[#allocation32_spill]]  ;;  %s2222_s1 = smov [#allocation6]  }
  0x5a   :  { %s67_s24 = sshll.u32 %s2222_s1, 4  ;;  %s2223_s9 = smov [#allocation9]   ;;  %s68_s24 = int_to_ptr.vmem [resolvable:$true] %s67_s24 }
  0x5b   :  { %s89_s22 = sshll.u32 %s2223_s9, 4  ;;  %s2087_s2 = scalar_lea.vmem %s68_s24, 16  ;;  %s90_s22 = int_to_ptr.vmem [resolvable:$true] %s89_s22 }
  0x5c   :  { %p2088_p7 = scmp.ne.s32.totalorder %s68_s24, %s2087_s2  ;;  %s2091_s18 = scalar_lea.vmem %s68_s24, 32 }
  0x5d   :  { %p2092_p8 = scmp.lt.s32.totalorder %s68_s24, %s68_s24  ;;  %p2093_p9 = scmp.lt.s32.totalorder %s2091_s18, %s2087_s2 }
  0x5f   :  { %48 = dma.hbm_to_vmem [thread:$0]  %s3391_s30, 16, %s46_s29, [#allocation3]  }
  0x60   :  { %p2094_p10 = por %p2093_p9, %p2092_p8 }
  0x62   :  { %p2095_p11 = pnand %p2094_p10, %p2088_p7 }
  0x64   :  { %2098 = shalt.err (!%p2095_p11)
}
  0x65   :  { %s3392_s28 = sld [smem:[#allocation34_spill]]  ;;  %s2107_s4 = scalar_lea.vmem %s90_s22, 16 }
  0x66   :  { %p2108_p12 = scmp.ne.s32.totalorder %s90_s22, %s2107_s4  ;;  %s2111_s29 = scalar_lea.vmem %s90_s22, 32 }
  0x67   :  { %p2112_p13 = scmp.lt.s32.totalorder %s90_s22, %s90_s22  ;;  %p2113_p0 = scmp.lt.s32.totalorder %s2111_s29, %s2107_s4 }
  0x69   :  { %p2114_p1 = por %p2113_p0, %p2112_p13 }
  0x6b   :  { %70 = dma.hbm_to_vmem [thread:$0]  %s3392_s28, 16, %s68_s24, [#allocation5]  }
  0x6c   :  { %p2115_p2 = pnand %p2114_p1, %p2108_p12 }
  0x6e   :  { %2118 = shalt.err (!%p2115_p2)
}
  0x6f   :  { %92 = dma.hbm_to_vmem [thread:$0]  %s3366_s7, 16, %s90_s22, [#allocation8]  }
  0x70   :  { %s2224_s23 = smov [#allocation12]   ;;  %s2225_s5 = smov [#allocation15]  }
  0x71   :  { %s110_s13 = sshll.u32 %s2224_s23, 4  ;;  %s132_s6 = sshll.u32 %s2225_s5, 4  ;;  %s111_s13 = int_to_ptr.vmem [resolvable:$true] %s110_s13  ;;  %s133_s6 = int_to_ptr.vmem [resolvable:$true] %s132_s6 }
  0x72   :  { %s2127_s30 = scalar_lea.vmem %s111_s13, 2048  ;;  %p2132_p4 = scmp.lt.s32.totalorder %s111_s13, %s111_s13 }
  0x73   :  { %p2128_p3 = scmp.ne.s32.totalorder %s111_s13, %s2127_s30  ;;  %p2133_p5 = scmp.lt.s32.totalorder %s2127_s30, %s2127_s30 }
  0x75   :  { %p2134_p6 = por %p2133_p5, %p2132_p4 }
  0x77   :  { %p2135_p7 = pnand %p2134_p6, %p2128_p3 }
  0x79   :  { %2138 = shalt.err (!%p2135_p7)
}
  0x7a   :  { %116 = dma.hbm_to_vmem [thread:$0]  %s3369_s10, 2048, %s111_s13, [#allocation11], %s2214_s27, %s2214_s27, %s2215_s3  }
  0x7b   :  { %s2147_s7 = scalar_lea.vmem %s133_s6, 2048  ;;  %p2152_p9 = scmp.lt.s32.totalorder %s133_s6, %s133_s6 }
  0x7c   :  { %p2148_p8 = scmp.ne.s32.totalorder %s133_s6, %s2147_s7  ;;  %p2153_p10 = scmp.lt.s32.totalorder %s2147_s7, %s2147_s7 }
  0x7e   :  { %p2154_p11 = por %p2153_p10, %p2152_p9 }
  0x80   :  { %p2155_p12 = pnand %p2154_p11, %p2148_p8 }
  0x82   :  { %2158 = shalt.err (!%p2155_p12)
}
  0x83   :  { %138 = dma.hbm_to_vmem [thread:$0]  %s3371_s12, 2048, %s133_s6, [#allocation14], %s2214_s27, %s2214_s27, %s2215_s3  }
  0x84   :  { %s2226_s2 = smov [#allocation18]   ;;  %s2227_s25 = smov [#allocation21]  }
  0x85   :  { %s159_s18 = sshll.u32 %s2226_s2, 4  ;;  %s183_s10 = sshll.u32 %s2227_s25, 4  ;;  %s160_s18 = int_to_ptr.vmem [resolvable:$true] %s159_s18  ;;  %s184_s10 = int_to_ptr.vmem [resolvable:$true] %s183_s10 }
  0x86   :  { %s2167_s26 = scalar_lea.vmem %s160_s18, 32  ;;  %p2172_p0 = scmp.lt.s32.totalorder %s160_s18, %s160_s18 }
  0x87   :  { %p2168_p13 = scmp.ne.s32.totalorder %s160_s18, %s2167_s26  ;;  %p2173_p1 = scmp.lt.s32.totalorder %s2167_s26, %s2167_s26 }
  0x89   :  { %p2174_p2 = por %p2173_p1, %p2172_p0 }
  0x8b   :  { %p2175_p3 = pnand %p2174_p2, %p2168_p13 }
  0x8d   :  { %2178 = shalt.err (!%p2175_p3)
}
  0x8e   :  { %162 = dma.hbm_to_vmem [thread:$0]  %s3375_s16, 32, %s160_s18, [#allocation17]  }
  0x8f   :  { %s2187_s29 = scalar_lea.vmem %s184_s10, 16  ;;  %s2191_s12 = scalar_lea.vmem %s184_s10, 32 }
  0x90   :  { %p2188_p4 = scmp.ne.s32.totalorder %s184_s10, %s2187_s29  ;;  %p2192_p5 = scmp.lt.s32.totalorder %s184_s10, %s184_s10 }
  0x91   :  { %p2193_p6 = scmp.lt.s32.totalorder %s2191_s12, %s2187_s29 }
  0x93   :  { %p2194_p7 = por %p2193_p6, %p2192_p5 }
  0x95   :  { %p2195_p8 = pnand %p2194_p7, %p2188_p4 }
  0x97   :  { %2198 = shalt.err (!%p2195_p8)
}
  0x98   :  { %186 = dma.hbm_to_vmem [thread:$0]  %s3379_s20, 16, %s184_s10, [#allocation20]  }
  0x99   :  { %2199 = dma.done.wait [#allocation3], 16  }
  0x9a   :  { %2200 = vsyncadd [#allocation3], 4294967280 }
  0x9b   :  { %2201 = dma.done.wait [#allocation5], 2064  }
  0x9c   :  { %2202 = vsyncadd [#allocation5], 4294965232 }
  0x9d   :  { %2203 = dma.done.wait [#allocation8], 2064  }
  0x9e   :  { %2204 = vsyncadd [#allocation8], 4294965232 }
  0x9f   :  { %2205 = dma.done.wait [#allocation11], 2064  }
  0xa0   :  { %2206 = vsyncadd [#allocation11], 4294965232 }
  0xa1   :  { %2207 = dma.done.wait [#allocation14], 2064  }
  0xa2   :  { %2208 = vsyncadd [#allocation14], 4294965232 }
  0xa3   :  { %2209 = dma.done.wait [#allocation17], 48  }
  0xa4   :  { %2210 = vsyncadd [#allocation17], 4294967248 }
  0xa5   :  { %2211 = dma.done.wait [#allocation20], 48  }
  0xa6   :  { %2212 = vsyncadd [#allocation20], 4294967248  ;;  %s3393_s0 = sld [smem:[#allocation31_spill]]  ;;  %vm2229_vm0 = vmmov 0  }
  0xa7   :  { %s3394_s1 = sld [smem:[#allocation29_spill]] }
  0xa8   :  { %s3395_s7 = sld [smem:[#allocation30_spill]] }
  0xac   :  { %v261_v0 = vld [vmem:[%s3393_s0 + $0xf8] sm:$0xff]  ;;  %v260_v4 = vld [vmem:[%s3393_s0 + $0xf0] sm:$0xff]  ;;  %v259_v8 = vld [vmem:[%s3393_s0 + $0xe8] sm:$0xff] }
  0xad   :  { %v293_v1 = vld [vmem:[%s3393_s0 + $0x1f8] sm:$0xff]  ;;  %1537 = vmatprep.subr.mxu0 %v261_v0  ;;  %v292_v5 = vld [vmem:[%s3393_s0 + $0x1f0] sm:$0xff]  ;;  %v291_v9 = vld [vmem:[%s3393_s0 + $0x1e8] sm:$0xff] }
  0xae   :  { %v245_v2 = vld [vmem:[%s3393_s0 + $0x78] sm:$0xff]  ;;  %1572 = vmatprep.subr.mxu1 %v293_v1  ;;  %v244_v6 = vld [vmem:[%s3393_s0 + $0x70] sm:$0xff]  ;;  %v243_v10 = vld [vmem:[%s3393_s0 + $0x68] sm:$0xff] }
  0xaf   :  { %v277_v3 = vld [vmem:[%s3393_s0 + $0x178] sm:$0xff]  ;;  %1538 = vmatpush3.msra.mxu0 %v245_v2  ;;  %v276_v7 = vld [vmem:[%s3393_s0 + $0x170] sm:$0xff]  ;;  %v275_v11 = vld [vmem:[%s3393_s0 + $0x168] sm:$0xff] }
  0xb0   :  { %1573 = vmatpush3.msra.mxu1 %v277_v3  ;;  %1539 = vmatprep.subr.mxu0 %v260_v4  ;;  %v258_v12 = vld [vmem:[%s3393_s0 + $0xe0] sm:$0xff]  ;;  %v257_v16 = vld [vmem:[%s3393_s0 + $0xd8] sm:$0xff]  ;;  %v256_v20 = vld [vmem:[%s3393_s0 + $0xd0] sm:$0xff] }
  0xb1   :  { %1574 = vmatprep.subr.mxu1 %v292_v5  ;;  %1540 = vmatpush3.msra.mxu0 %v244_v6  ;;  %v290_v13 = vld [vmem:[%s3393_s0 + $0x1e0] sm:$0xff]  ;;  %v289_v17 = vld [vmem:[%s3393_s0 + $0x1d8] sm:$0xff]  ;;  %v288_v21 = vld [vmem:[%s3393_s0 + $0x1d0] sm:$0xff]  ;;  %v2228_v5 = vmov 0.0  }
  0xb2   :  { %1575 = vmatpush3.msra.mxu1 %v276_v7  ;;  %1541 = vmatprep.subr.mxu0 %v259_v8  ;;  %v242_v14 = vld [vmem:[%s3393_s0 + $0x60] sm:$0xff]  ;;  %v241_v18 = vld [vmem:[%s3393_s0 + $0x58] sm:$0xff]  ;;  %v240_v22 = vld [vmem:[%s3393_s0 + $0x50] sm:$0xff] }
  0xb3   :  { %1576 = vmatprep.subr.mxu1 %v291_v9  ;;  %v274_v15 = vld [vmem:[%s3393_s0 + $0x160] sm:$0xff]  ;;  %1542 = vmatpush3.msra.mxu0 %v243_v10  ;;  %v273_v19 = vld [vmem:[%s3393_s0 + $0x158] sm:$0xff]  ;;  %v272_v23 = vld [vmem:[%s3393_s0 + $0x150] sm:$0xff] }
  0xb4   :  { %1577 = vmatpush3.msra.mxu1 %v275_v11  ;;  %1543 = vmatprep.subr.mxu0 %v258_v12  ;;  %v255_v24 = vld [vmem:[%s3393_s0 + $0xc8] sm:$0xff]  ;;  %v254_v28 = vld [vmem:[%s3393_s0 + $0xc0] sm:$0xff]  ;;  %v253_v32 = vld [vmem:[%s3393_s0 + $0xb8] sm:$0xff] }
  0xb5   :  { %1578 = vmatprep.subr.mxu1 %v290_v13  ;;  %1544 = vmatpush3.msra.mxu0 %v242_v14  ;;  %v287_v25 = vld [vmem:[%s3393_s0 + $0x1c8] sm:$0xff]  ;;  %v286_v29 = vld [vmem:[%s3393_s0 + $0x1c0] sm:$0xff]  ;;  %v285_v33 = vld [vmem:[%s3393_s0 + $0x1b8] sm:$0xff] }
  0xb6   :  { %1579 = vmatpush3.msra.mxu1 %v274_v15  ;;  %1545 = vmatprep.subr.mxu0 %v257_v16  ;;  %v239_v26 = vld [vmem:[%s3393_s0 + $0x48] sm:$0xff]  ;;  %v238_v30 = vld [vmem:[%s3393_s0 + $0x40] sm:$0xff]  ;;  %v237_v34 = vld [vmem:[%s3393_s0 + $0x38] sm:$0xff] }
  0xb7   :  { %1580 = vmatprep.subr.mxu1 %v289_v17  ;;  %1546 = vmatpush3.msra.mxu0 %v241_v18  ;;  %v271_v27 = vld [vmem:[%s3393_s0 + $0x148] sm:$0xff]  ;;  %v270_v31 = vld [vmem:[%s3393_s0 + $0x140] sm:$0xff]  ;;  %v269_v35 = vld [vmem:[%s3393_s0 + $0x138] sm:$0xff] }
  0xb8   :  { %1581 = vmatpush3.msra.mxu1 %v273_v19  ;;  %1547 = vmatprep.subr.mxu0 %v256_v20  ;;  %v252_v36 = vld [vmem:[%s3393_s0 + $0xb0] sm:$0xff]  ;;  %v251_v40 = vld [vmem:[%s3393_s0 + $0xa8] sm:$0xff]  ;;  %v250_v44 = vld [vmem:[%s3393_s0 + $0xa0] sm:$0xff] }
  0xb9   :  { %1582 = vmatprep.subr.mxu1 %v288_v21  ;;  %1548 = vmatpush3.msra.mxu0 %v240_v22  ;;  %v284_v37 = vld [vmem:[%s3393_s0 + $0x1b0] sm:$0xff]  ;;  %v283_v41 = vld [vmem:[%s3393_s0 + $0x1a8] sm:$0xff]  ;;  %v282_v45 = vld [vmem:[%s3393_s0 + $0x1a0] sm:$0xff] }
  0xba   :  { %1583 = vmatpush3.msra.mxu1 %v272_v23  ;;  %1549 = vmatprep.subr.mxu0 %v255_v24  ;;  %v236_v38 = vld [vmem:[%s3393_s0 + $0x30] sm:$0xff]  ;;  %v235_v42 = vld [vmem:[%s3393_s0 + $0x28] sm:$0xff]  ;;  %v234_v46 = vld [vmem:[%s3393_s0 + $0x20] sm:$0xff] }
  0xbb   :  { %1584 = vmatprep.subr.mxu1 %v287_v25  ;;  %1550 = vmatpush3.msra.mxu0 %v239_v26  ;;  %v268_v39 = vld [vmem:[%s3393_s0 + $0x130] sm:$0xff]  ;;  %v267_v43 = vld [vmem:[%s3393_s0 + $0x128] sm:$0xff]  ;;  %v266_v47 = vld [vmem:[%s3393_s0 + $0x120] sm:$0xff] }
  0xbc   :  { %1585 = vmatpush3.msra.mxu1 %v271_v27  ;;  %1551 = vmatprep.subr.mxu0 %v254_v28  ;;  %v249_v48 = vld [vmem:[%s3393_s0 + $0x98] sm:$0xff]  ;;  %v248_v52 = vld [vmem:[%s3393_s0 + $0x90] sm:$0xff]  ;;  %v247_v56 = vld [vmem:[%s3393_s0 + $0x88] sm:$0xff] }
  0xbd   :  { %1586 = vmatprep.subr.mxu1 %v286_v29  ;;  %1552 = vmatpush3.msra.mxu0 %v238_v30  ;;  %v281_v49 = vld [vmem:[%s3393_s0 + $0x198] sm:$0xff]  ;;  %v280_v53 = vld [vmem:[%s3393_s0 + $0x190] sm:$0xff]  ;;  %v279_v57 = vld [vmem:[%s3393_s0 + $0x188] sm:$0xff] }
  0xbe   :  { %1587 = vmatpush3.msra.mxu1 %v270_v31  ;;  %1553 = vmatprep.subr.mxu0 %v253_v32  ;;  %v233_v50 = vld [vmem:[%s3393_s0 + $0x18] sm:$0xff]  ;;  %v232_v54 = vld [vmem:[%s3393_s0 + $0x10] sm:$0xff]  ;;  %v231_v58 = vld [vmem:[%s3393_s0 + $0x8] sm:$0xff] }
  0xbf   :  { %1588 = vmatprep.subr.mxu1 %v285_v33  ;;  %1554 = vmatpush3.msra.mxu0 %v237_v34  ;;  %v265_v51 = vld [vmem:[%s3393_s0 + $0x118] sm:$0xff]  ;;  %v264_v55 = vld [vmem:[%s3393_s0 + $0x110] sm:$0xff]  ;;  %v263_v59 = vld [vmem:[%s3393_s0 + $0x108] sm:$0xff] }
  0xc0   :  { %1589 = vmatpush3.msra.mxu1 %v269_v35  ;;  %1555 = vmatprep.subr.mxu0 %v252_v36  ;;  %v246_v60 = vld [vmem:[%s3393_s0 + $0x80] sm:$0xff]  ;;  %v227_v63 = vld [vmem:[%s3394_s1 + $0x8] sm:$0xff]  ;;  %v229_v1 = vld [vmem:[%s3394_s1 + $0x18] sm:$0xff] }
  0xc1   :  { %1590 = vmatprep.subr.mxu1 %v284_v37  ;;  %1556 = vmatpush3.msra.mxu0 %v236_v38  ;;  %v278_v61 = vld [vmem:[%s3393_s0 + $0x180] sm:$0xff]  ;;  %v228_v3 = vld [vmem:[%s3394_s1 + $0x10] sm:$0xff] }
  0xc2   :  { %1591 = vmatpush3.msra.mxu1 %v268_v39  ;;  %1557 = vmatprep.subr.mxu0 %v251_v40  ;;  %v230_v62 = vld [vmem:[%s3393_s0] sm:$0xff]  ;;  %v456_v6 = vld [vmem:[#allocation4 + $0x70] sm:$0xff]  ;;  %v455_v7 = vld [vmem:[#allocation4 + $0x68] sm:$0xff] }
  0xc3   :  { %1592 = vmatprep.subr.mxu1 %v283_v41  ;;  %1558 = vmatpush3.msra.mxu0 %v235_v42  ;;  %v262_v0 = vld [vmem:[%s3393_s0 + $0x100] sm:$0xff]  ;;  %v452_v10 = vld [vmem:[#allocation4 + $0x50] sm:$0xff]  ;;  %v451_v11 = vld [vmem:[#allocation4 + $0x48] sm:$0xff] }
  0xc4   :  { %1593 = vmatpush3.msra.mxu1 %v267_v43  ;;  %1559 = vmatprep.subr.mxu0 %v250_v44  ;;  %v226_v2 = vld [vmem:[%s3394_s1] sm:$0xff]  ;;  %v448_v14 = vld [vmem:[#allocation4 + $0x30] sm:$0xff]  ;;  %v447_v15 = vld [vmem:[#allocation4 + $0x28] sm:$0xff] }
  0xc5   :  { %1594 = vmatprep.subr.mxu1 %v282_v45  ;;  %1560 = vmatpush3.msra.mxu0 %v234_v46  ;;  %v457_v4 = vld [vmem:[#allocation4 + $0x78] sm:$0xff]  ;;  %v454_v8 = vld [vmem:[#allocation4 + $0x60] sm:$0xff]  ;;  %v444_v18 = vld [vmem:[#allocation4 + $0x10] sm:$0xff] }
  0xc6   :  { %1595 = vmatpush3.msra.mxu1 %v266_v47  ;;  %1561 = vmatprep.subr.mxu0 %v249_v48  ;;  %v453_v9 = vld [vmem:[#allocation4 + $0x58] sm:$0xff]  ;;  %v450_v12 = vld [vmem:[#allocation4 + $0x40] sm:$0xff]  ;;  %v443_v19 = vld [vmem:[#allocation4 + $0x8] sm:$0xff] }
  0xc7   :  { %1596 = vmatprep.subr.mxu1 %v281_v49  ;;  %1562 = vmatpush3.msra.mxu0 %v233_v50  ;;  %v449_v13 = vld [vmem:[#allocation4 + $0x38] sm:$0xff]  ;;  %v446_v16 = vld [vmem:[#allocation4 + $0x20] sm:$0xff]  ;;  %v549_v23 = vld [vmem:[#allocation7 + $0x68] sm:$0xff] }
  0xc8   :  { %1597 = vmatpush3.msra.mxu1 %v265_v51  ;;  %1563 = vmatprep.subr.mxu0 %v248_v52  ;;  %v445_v17 = vld [vmem:[#allocation4 + $0x18] sm:$0xff]  ;;  %v442_v20 = vld [vmem:[#allocation4] sm:$0xff]  ;;  %v545_v27 = vld [vmem:[#allocation7 + $0x48] sm:$0xff] }
  0xc9   :  { %1598 = vmatprep.subr.mxu1 %v280_v53  ;;  %1564 = vmatpush3.msra.mxu0 %v232_v54  ;;  %v551_v21 = vld [vmem:[#allocation7 + $0x78] sm:$0xff]  ;;  %v550_v22 = vld [vmem:[#allocation7 + $0x70] sm:$0xff]  ;;  %v548_v24 = vld [vmem:[#allocation7 + $0x60] sm:$0xff] }
  0xca   :  { %1599 = vmatpush3.msra.mxu1 %v264_v55  ;;  %1565 = vmatprep.subr.mxu0 %v247_v56  ;;  %v547_v25 = vld [vmem:[#allocation7 + $0x58] sm:$0xff]  ;;  %v546_v26 = vld [vmem:[#allocation7 + $0x50] sm:$0xff]  ;;  %v544_v28 = vld [vmem:[#allocation7 + $0x40] sm:$0xff] }
  0xcb   :  { %1600 = vmatprep.subr.mxu1 %v279_v57  ;;  %1566 = vmatpush3.msra.mxu0 %v231_v58  ;;  %v543_v29 = vld [vmem:[#allocation7 + $0x38] sm:$0xff]  ;;  %v542_v30 = vld [vmem:[#allocation7 + $0x30] sm:$0xff]  ;;  %v541_v31 = vld [vmem:[#allocation7 + $0x28] sm:$0xff] }
  0xcc   :  { %1601 = vmatpush3.msra.mxu1 %v263_v59  ;;  %1567 = vmatprep.subr.mxu0 %v246_v60  ;;  %v540_v32 = vld [vmem:[#allocation7 + $0x20] sm:$0xff]  ;;  %v539_v33 = vld [vmem:[#allocation7 + $0x18] sm:$0xff]  ;;  %v538_v34 = vld [vmem:[#allocation7 + $0x10] sm:$0xff] }
  0xcd   :  { %1602 = vmatprep.subr.mxu1 %v278_v61  ;;  %1568 = vmatpush3.msra.mxu0 %v230_v62  ;;  %v1530_v37 = vld [vmem:[#allocation2] ss:$0 sm:$0xff]  ;;  %v664_v45 = vld [vmem:[%s3367_s8 + $0xf8] sm:$0xff]  ;;  %v537_v46 = vld [vmem:[#allocation7 + $0x8] sm:$0xff] }
  0xce   :  { %365 = vmatprep.mubr.f32.mxu0 %v227_v63  ;;  %1603 = vmatpush3.msra.mxu1 %v262_v0  ;;  %v648_v47 = vld [vmem:[%s3367_s8 + $0x78] sm:$0xff]  ;;  %v663_v48 = vld [vmem:[%s3367_s8 + $0xf0] sm:$0xff]  ;;  %v536_v49 = vld [vmem:[#allocation7] sm:$0xff] }
  0xcf   :  { %435 = vmatprep.mubr.f32.mxu1 %v229_v1  ;;  %366 = vmatmul.mubr.f32.vlgmr.msra.gmra.mxu0 %v226_v2  ;;  %v647_v50 = vld [vmem:[%s3367_s8 + $0x70] sm:$0xff]  ;;  %v662_v51 = vld [vmem:[%s3367_s8 + $0xe8] sm:$0xff]  ;;  %v696_v52 = vld [vmem:[%s3367_s8 + $0x1f8] sm:$0xff] }
  0xd0   :  { %436 = vmatmul.mubr.f32.vlgmr.msra.gmra.mxu1 %v228_v3  ;;  %1780 = vmatprep.subr.mxu0 %v2228_v5  ;;  %v646_v53 = vld [vmem:[%s3367_s8 + $0x68] sm:$0xff]  ;;  %v661_v54 = vld [vmem:[%s3367_s8 + $0xe0] sm:$0xff]  ;;  %v660_v56 = vld [vmem:[%s3367_s8 + $0xd8] sm:$0xff] }
  0xd1   :  { %1815 = vmatprep.subr.mxu1 %v2228_v5  ;;  %1781 = vmatpush3.msra.mxu0 %v457_v4  ;;  %v645_v55 = vld [vmem:[%s3367_s8 + $0x60] sm:$0xff]  ;;  %v644_v57 = vld [vmem:[%s3367_s8 + $0x58] sm:$0xff]  ;;  %v659_v58 = vld [vmem:[%s3367_s8 + $0xd0] sm:$0xff] }
  0xd2   :  { %1782 = vmatprep.subr.mxu0 %v2228_v5  ;;  %1812 = vmatprep.mubr.msk.f32.mxu0 %vm2229_vm0, %v2228_v5  ;;  %v643_v59 = vld [vmem:[%s3367_s8 + $0x50] sm:$0xff]  ;;  %v658_v60 = vld [vmem:[%s3367_s8 + $0xc8] sm:$0xff]  ;;  %v657_v62 = vld [vmem:[%s3367_s8 + $0xc0] sm:$0xff] }
  0xd3   :  { %1783 = vmatpush3.msra.mxu0 %v456_v6  ;;  %1847 = vmatprep.mubr.msk.f32.mxu1 %vm2229_vm0, %v2228_v5  ;;  %v642_v61 = vld [vmem:[%s3367_s8 + $0x48] sm:$0xff]  ;;  %v641_v63 = vld [vmem:[%s3367_s8 + $0x40] sm:$0xff]  ;;  %v656_v0 = vld [vmem:[%s3367_s8 + $0xb8] sm:$0xff] }
  0xd4   :  { %1784 = vmatprep.subr.mxu0 %v2228_v5  ;;  %1816 = vmatpush3.msra.mxu1 %v551_v21  ;;  %v640_v1 = vld [vmem:[%s3367_s8 + $0x38] sm:$0xff]  ;;  %v655_v2 = vld [vmem:[%s3367_s8 + $0xb0] sm:$0xff]  ;;  %v654_v4 = vld [vmem:[%s3367_s8 + $0xa8] sm:$0xff] }
  0xd5   :  { %1785 = vmatpush3.msra.mxu0 %v455_v7  ;;  %1817 = vmatprep.subr.mxu1 %v2228_v5  ;;  %v639_v3 = vld [vmem:[%s3367_s8 + $0x30] sm:$0xff]  ;;  %v638_v6 = vld [vmem:[%s3367_s8 + $0x28] sm:$0xff]  ;;  %v653_v7 = vld [vmem:[%s3367_s8 + $0xa0] sm:$0xff] }
  0xd6   :  { %1786 = vmatprep.subr.mxu0 %v2228_v5  ;;  %1818 = vmatpush3.msra.mxu1 %v550_v22 }
  0xd7   :  { %1787 = vmatpush3.msra.mxu0 %v454_v8  ;;  %1819 = vmatprep.subr.mxu1 %v2228_v5  ;;  %v637_v8 = vld [vmem:[%s3367_s8 + $0x20] sm:$0xff] }
  0xd8   :  { %1788 = vmatprep.subr.mxu0 %v2228_v5  ;;  %1820 = vmatpush3.msra.mxu1 %v549_v23 }
  0xd9   :  { %1789 = vmatpush3.msra.mxu0 %v453_v9  ;;  %1821 = vmatprep.subr.mxu1 %v2228_v5  ;;  %v652_v9 = vld [vmem:[%s3367_s8 + $0x98] sm:$0xff] }
  0xda   :  { %1790 = vmatprep.subr.mxu0 %v2228_v5  ;;  %1822 = vmatpush3.msra.mxu1 %v548_v24  ;;  %v680_v24 = vld [vmem:[%s3367_s8 + $0x178] sm:$0xff] }
  0xdb   :  { %1791 = vmatpush3.msra.mxu0 %v452_v10  ;;  %1823 = vmatprep.subr.mxu1 %v2228_v5  ;;  %v636_v10 = vld [vmem:[%s3367_s8 + $0x18] sm:$0xff] }
  0xdc   :  { %1792 = vmatprep.subr.mxu0 %v2228_v5  ;;  %1824 = vmatpush3.msra.mxu1 %v547_v25  ;;  %v632_v25 = vld [vmem:[%s3395_s7 + $0x18] sm:$0xff] }
  0xdd   :  { %1793 = vmatpush3.msra.mxu0 %v451_v11  ;;  %1825 = vmatprep.subr.mxu1 %v2228_v5  ;;  %v651_v11 = vld [vmem:[%s3367_s8 + $0x90] sm:$0xff] }
  0xde   :  { %1794 = vmatprep.subr.mxu0 %v2228_v5  ;;  %1826 = vmatpush3.msra.mxu1 %v546_v26  ;;  %v695_v26 = vld [vmem:[%s3367_s8 + $0x1f0] sm:$0xff] }
  0xdf   :  { %1795 = vmatpush3.msra.mxu0 %v450_v12  ;;  %1827 = vmatprep.subr.mxu1 %v2228_v5  ;;  %v635_v12 = vld [vmem:[%s3367_s8 + $0x10] sm:$0xff] }
  0xe0   :  { %1796 = vmatprep.subr.mxu0 %v2228_v5  ;;  %1828 = vmatpush3.msra.mxu1 %v545_v27  ;;  %v679_v27 = vld [vmem:[%s3367_s8 + $0x170] sm:$0xff] }
  0xe1   :  { %1797 = vmatpush3.msra.mxu0 %v449_v13  ;;  %1829 = vmatprep.subr.mxu1 %v2228_v5  ;;  %v650_v13 = vld [vmem:[%s3367_s8 + $0x88] sm:$0xff] }
  0xe2   :  { %1798 = vmatprep.subr.mxu0 %v2228_v5  ;;  %1830 = vmatpush3.msra.mxu1 %v544_v28  ;;  %v694_v28 = vld [vmem:[%s3367_s8 + $0x1e8] sm:$0xff] }
  0xe3   :  { %1799 = vmatpush3.msra.mxu0 %v448_v14  ;;  %1831 = vmatprep.subr.mxu1 %v2228_v5  ;;  %v634_v14 = vld [vmem:[%s3367_s8 + $0x8] sm:$0xff] }
  0xe4   :  { %1800 = vmatprep.subr.mxu0 %v2228_v5  ;;  %1832 = vmatpush3.msra.mxu1 %v543_v29  ;;  %v678_v29 = vld [vmem:[%s3367_s8 + $0x168] sm:$0xff] }
  0xe5   :  { %1801 = vmatpush3.msra.mxu0 %v447_v15  ;;  %1833 = vmatprep.subr.mxu1 %v2228_v5  ;;  %v649_v15 = vld [vmem:[%s3367_s8 + $0x80] sm:$0xff] }
  0xe6   :  { %1802 = vmatprep.subr.mxu0 %v2228_v5  ;;  %1834 = vmatpush3.msra.mxu1 %v542_v30  ;;  %v693_v30 = vld [vmem:[%s3367_s8 + $0x1e0] sm:$0xff] }
  0xe7   :  { %1803 = vmatpush3.msra.mxu0 %v446_v16  ;;  %1835 = vmatprep.subr.mxu1 %v2228_v5  ;;  %v633_v16 = vld [vmem:[%s3367_s8] sm:$0xff] }
  0xe8   :  { %1804 = vmatprep.subr.mxu0 %v2228_v5  ;;  %1836 = vmatpush3.msra.mxu1 %v541_v31  ;;  %v677_v31 = vld [vmem:[%s3367_s8 + $0x160] sm:$0xff] }
  0xe9   :  { %1805 = vmatpush3.msra.mxu0 %v445_v17  ;;  %1837 = vmatprep.subr.mxu1 %v2228_v5  ;;  %v630_v17 = vld [vmem:[%s3395_s7 + $0x8] sm:$0xff] }
  0xea   :  { %1806 = vmatprep.subr.mxu0 %v2228_v5  ;;  %1838 = vmatpush3.msra.mxu1 %v540_v32  ;;  %v692_v32 = vld [vmem:[%s3367_s8 + $0x1d8] sm:$0xff] }
  0xeb   :  { %1807 = vmatpush3.msra.mxu0 %v444_v18  ;;  %1839 = vmatprep.subr.mxu1 %v2228_v5  ;;  %v629_v18 = vld [vmem:[%s3395_s7] sm:$0xff] }
  0xec   :  { %1808 = vmatprep.subr.mxu0 %v2228_v5  ;;  %1840 = vmatpush3.msra.mxu1 %v539_v33  ;;  %v676_v33 = vld [vmem:[%s3367_s8 + $0x158] sm:$0xff] }
  0xed   :  { %1809 = vmatpush3.msra.mxu0 %v443_v19  ;;  %1841 = vmatprep.subr.mxu1 %v2228_v5  ;;  %v1531_v19 = vld [vmem:[#allocation6] ss:$0 sm:$0xff] }
  0xee   :  { %1810 = vmatprep.subr.mxu0 %v2228_v5  ;;  %1842 = vmatpush3.msra.mxu1 %v538_v34  ;;  %v691_v34 = vld [vmem:[%s3367_s8 + $0x1d0] sm:$0xff] }
  0xef   :  { %1811 = vmatpush3.msra.mxu0 %v442_v20  ;;  %1843 = vmatprep.subr.mxu1 %v2228_v5 }
  0xf0   :  { %1641 = vmatprep.subr.mxu0 %v664_v45  ;;  %1844 = vmatpush3.msra.mxu1 %v537_v46  ;;  %v670_v45 = vld [vmem:[%s3367_s8 + $0x128] sm:$0xff]  ;;  %v685_v46 = vld [vmem:[%s3367_s8 + $0x1a0] sm:$0xff] }
  0xf1   :  { %1845 = vmatprep.subr.mxu1 %v2228_v5 }
  0xf2   :  { %1846 = vmatpush3.msra.mxu1 %v536_v49  ;;  %v668_v49 = vld [vmem:[%s3367_s8 + $0x118] sm:$0xff] }
  0xf3   :  { %1676 = vmatprep.subr.mxu1 %v696_v52  ;;  %v682_v52 = vld [vmem:[%s3367_s8 + $0x188] sm:$0xff] }
 0x18f   :  { %v1569_v35 = vpop.f32.mrf.mxu0 }
 0x190   :  { %v1604_v36 = vpop.f32.mrf.mxu1 }
 0x191   :  { %v1570_v38 = vpop.f32.mrf.mxu0 }
 0x192   :  { %v1605_v39 = vpop.f32.mrf.mxu1  ;;  %v1571_v40 = vadd.f32 %v1570_v38, %v1569_v35  ;;  %v675_v35 = vld [vmem:[%s3367_s8 + $0x150] sm:$0xff]  ;;  %v689_v38 = vld [vmem:[%s3367_s8 + $0x1c0] sm:$0xff] }
 0x193   :  { %v1606_v42 = vadd.f32 %v1605_v39, %v1604_v36  ;;  %v690_v36 = vld [vmem:[%s3367_s8 + $0x1c8] sm:$0xff]  ;;  %v673_v39 = vld [vmem:[%s3367_s8 + $0x140] sm:$0xff] }
 0x194   :  { %v368_v41 = vadd.f32 %v1571_v40, %v1530_v37  ;;  %v674_v37 = vld [vmem:[%s3367_s8 + $0x148] sm:$0xff]  ;;  %v688_v40 = vld [vmem:[%s3367_s8 + $0x1b8] sm:$0xff] }
 0x196   :  { %v438_v43 = vadd.f32 %v1606_v42, %v368_v41  ;;  %v672_v41 = vld [vmem:[%s3367_s8 + $0x138] sm:$0xff]  ;;  %v687_v42 = vld [vmem:[%s3367_s8 + $0x1b0] sm:$0xff] }
 0x198   :  { %v441_v44 = vmax.f32 %v438_v43, 0.0  ;;  %v671_v43 = vld [vmem:[%s3367_s8 + $0x130] sm:$0xff] }
 0x19a   :  { %1813 = vmatmul.mubr.f32.vlgmr.msra.gmra.mxu0 %v441_v44  ;;  %v686_v44 = vld [vmem:[%s3367_s8 + $0x1a8] sm:$0xff] }
 0x19b   :  { %1642 = vmatpush3.msra.mxu0 %v648_v47  ;;  %768 = vmatprep.mubr.f32.mxu0 %v630_v17  ;;  %v669_v47 = vld [vmem:[%s3367_s8 + $0x120] sm:$0xff]  ;;  %v947_v17 = vld [vmem:[#allocation15 + $0x40] sm:$0xff] }
 0x19c   :  { %1643 = vmatprep.subr.mxu0 %v663_v48  ;;  %v684_v48 = vld [vmem:[%s3367_s8 + $0x198] sm:$0xff] }
 0x19d   :  { %1644 = vmatpush3.msra.mxu0 %v647_v50  ;;  %v683_v50 = vld [vmem:[%s3367_s8 + $0x190] sm:$0xff] }
 0x19e   :  { %1645 = vmatprep.subr.mxu0 %v662_v51  ;;  %v667_v51 = vld [vmem:[%s3367_s8 + $0x110] sm:$0xff] }
 0x19f   :  { %1646 = vmatpush3.msra.mxu0 %v646_v53  ;;  %v666_v53 = vld [vmem:[%s3367_s8 + $0x108] sm:$0xff] }
 0x1a0   :  { %1647 = vmatprep.subr.mxu0 %v661_v54  ;;  %v681_v54 = vld [vmem:[%s3367_s8 + $0x180] sm:$0xff] }
 0x1a1   :  { %1648 = vmatpush3.msra.mxu0 %v645_v55  ;;  %v665_v55 = vld [vmem:[%s3367_s8 + $0x100] sm:$0xff] }
 0x1a2   :  { %1649 = vmatprep.subr.mxu0 %v660_v56  ;;  %v631_v56 = vld [vmem:[%s3395_s7 + $0x10] sm:$0xff] }
 0x1a3   :  { %1650 = vmatpush3.msra.mxu0 %v644_v57  ;;  %v860_v57 = vld [vmem:[#allocation12 + $0x78] sm:$0xff] }
 0x1a4   :  { %1651 = vmatprep.subr.mxu0 %v659_v58  ;;  %v859_v58 = vld [vmem:[#allocation12 + $0x70] sm:$0xff] }
 0x1a5   :  { %1652 = vmatpush3.msra.mxu0 %v643_v59  ;;  %v858_v59 = vld [vmem:[#allocation12 + $0x68] sm:$0xff] }
 0x1a6   :  { %1653 = vmatprep.subr.mxu0 %v658_v60  ;;  %v857_v60 = vld [vmem:[#allocation12 + $0x60] sm:$0xff] }
 0x1a7   :  { %1654 = vmatpush3.msra.mxu0 %v642_v61  ;;  %v856_v61 = vld [vmem:[#allocation12 + $0x58] sm:$0xff] }
 0x1a8   :  { %1655 = vmatprep.subr.mxu0 %v657_v62  ;;  %v855_v62 = vld [vmem:[#allocation12 + $0x50] sm:$0xff] }
 0x1a9   :  { %1656 = vmatpush3.msra.mxu0 %v641_v63  ;;  %v854_v63 = vld [vmem:[#allocation12 + $0x48] sm:$0xff] }
 0x1aa   :  { %1657 = vmatprep.subr.mxu0 %v656_v0  ;;  %v853_v0 = vld [vmem:[#allocation12 + $0x40] sm:$0xff] }
 0x1ab   :  { %1658 = vmatpush3.msra.mxu0 %v640_v1  ;;  %v852_v1 = vld [vmem:[#allocation12 + $0x38] sm:$0xff] }
 0x1ac   :  { %1659 = vmatprep.subr.mxu0 %v655_v2  ;;  %v851_v2 = vld [vmem:[#allocation12 + $0x30] sm:$0xff] }
 0x1ad   :  { %1660 = vmatpush3.msra.mxu0 %v639_v3  ;;  %v850_v3 = vld [vmem:[#allocation12 + $0x28] sm:$0xff] }
 0x1ae   :  { %1661 = vmatprep.subr.mxu0 %v654_v4  ;;  %v849_v4 = vld [vmem:[#allocation12 + $0x20] sm:$0xff] }
 0x1af   :  { %1662 = vmatpush3.msra.mxu0 %v638_v6  ;;  %v848_v6 = vld [vmem:[#allocation12 + $0x18] sm:$0xff] }
 0x1b0   :  { %1663 = vmatprep.subr.mxu0 %v653_v7  ;;  %v847_v7 = vld [vmem:[#allocation12 + $0x10] sm:$0xff] }
 0x1b1   :  { %1664 = vmatpush3.msra.mxu0 %v637_v8  ;;  %v846_v8 = vld [vmem:[#allocation12 + $0x8] sm:$0xff] }
 0x1b2   :  { %1665 = vmatprep.subr.mxu0 %v652_v9  ;;  %v845_v9 = vld [vmem:[#allocation12] sm:$0xff] }
 0x1b3   :  { %1666 = vmatpush3.msra.mxu0 %v636_v10  ;;  %v954_v10 = vld [vmem:[#allocation15 + $0x78] sm:$0xff] }
 0x1b4   :  { %1667 = vmatprep.subr.mxu0 %v651_v11  ;;  %v953_v11 = vld [vmem:[#allocation15 + $0x70] sm:$0xff] }
 0x1b5   :  { %1668 = vmatpush3.msra.mxu0 %v635_v12  ;;  %v952_v12 = vld [vmem:[#allocation15 + $0x68] sm:$0xff] }
 0x1b6   :  { %1669 = vmatprep.subr.mxu0 %v650_v13  ;;  %v951_v13 = vld [vmem:[#allocation15 + $0x60] sm:$0xff] }
 0x1b7   :  { %1670 = vmatpush3.msra.mxu0 %v634_v14  ;;  %v950_v14 = vld [vmem:[#allocation15 + $0x58] sm:$0xff] }
 0x1b8   :  { %1671 = vmatprep.subr.mxu0 %v649_v15  ;;  %v949_v15 = vld [vmem:[#allocation15 + $0x50] sm:$0xff] }
 0x1b9   :  { %1672 = vmatpush3.msra.mxu0 %v633_v16  ;;  %v948_v16 = vld [vmem:[#allocation15 + $0x48] sm:$0xff] }
 0x1ba   :  { %769 = vmatmul.mubr.f32.vlgmr.msra.gmra.mxu0 %v629_v18  ;;  %1850 = vmatprep.subr.mxu0 %v2228_v5  ;;  %v946_v18 = vld [vmem:[#allocation15 + $0x38] sm:$0xff] }
 0x1bb   :  { %1882 = vmatprep.mubr.msk.f32.mxu0 %vm2229_vm0, %v2228_v5  ;;  %1851 = vmatpush3.msra.mxu0 %v860_v57  ;;  %v1077_v57 = vld [vmem:[%s3374_s15 + $0x68] sm:$0xff] }
 0x1bc   :  { %1852 = vmatprep.subr.mxu0 %v2228_v5 }
 0x1bd   :  { %1853 = vmatpush3.msra.mxu0 %v859_v58  ;;  %v1076_v58 = vld [vmem:[%s3374_s15 + $0x60] sm:$0xff] }
 0x1be   :  { %1854 = vmatprep.subr.mxu0 %v2228_v5 }
 0x1bf   :  { %1855 = vmatpush3.msra.mxu0 %v858_v59  ;;  %v1075_v59 = vld [vmem:[%s3374_s15 + $0x58] sm:$0xff] }
 0x1c0   :  { %1856 = vmatprep.subr.mxu0 %v2228_v5 }
 0x1c1   :  { %1857 = vmatpush3.msra.mxu0 %v857_v60  ;;  %v1074_v60 = vld [vmem:[%s3374_s15 + $0x50] sm:$0xff] }
 0x1c2   :  { %1858 = vmatprep.subr.mxu0 %v2228_v5 }
 0x1c3   :  { %1859 = vmatpush3.msra.mxu0 %v856_v61  ;;  %v1073_v61 = vld [vmem:[%s3374_s15 + $0x48] sm:$0xff] }
 0x1c4   :  { %1860 = vmatprep.subr.mxu0 %v2228_v5 }
 0x1c5   :  { %1861 = vmatpush3.msra.mxu0 %v855_v62  ;;  %v1072_v62 = vld [vmem:[%s3374_s15 + $0x40] sm:$0xff] }
 0x1c6   :  { %1862 = vmatprep.subr.mxu0 %v2228_v5 }
 0x1c7   :  { %1863 = vmatpush3.msra.mxu0 %v854_v63  ;;  %v1071_v63 = vld [vmem:[%s3374_s15 + $0x38] sm:$0xff] }
 0x1c8   :  { %1864 = vmatprep.subr.mxu0 %v2228_v5 }
 0x1c9   :  { %1865 = vmatpush3.msra.mxu0 %v853_v0  ;;  %v1070_v0 = vld [vmem:[%s3374_s15 + $0x30] sm:$0xff] }
 0x1ca   :  { %1866 = vmatprep.subr.mxu0 %v2228_v5 }
 0x1cb   :  { %1867 = vmatpush3.msra.mxu0 %v852_v1  ;;  %v1069_v1 = vld [vmem:[%s3374_s15 + $0x28] sm:$0xff] }
 0x1cc   :  { %1868 = vmatprep.subr.mxu0 %v2228_v5 }
 0x1cd   :  { %1869 = vmatpush3.msra.mxu0 %v851_v2  ;;  %v1068_v2 = vld [vmem:[%s3374_s15 + $0x20] sm:$0xff] }
 0x1ce   :  { %1870 = vmatprep.subr.mxu0 %v2228_v5 }
 0x1cf   :  { %1871 = vmatpush3.msra.mxu0 %v850_v3  ;;  %v1067_v3 = vld [vmem:[%s3374_s15 + $0x18] sm:$0xff] }
 0x1d0   :  { %1872 = vmatprep.subr.mxu0 %v2228_v5 }
 0x1d1   :  { %1873 = vmatpush3.msra.mxu0 %v849_v4  ;;  %v1534_v4 = vld [vmem:[#allocation13] ss:$0 sm:$0xff] }
 0x1d2   :  { %1874 = vmatprep.subr.mxu0 %v2228_v5 }
 0x1d3   :  { %1875 = vmatpush3.msra.mxu0 %v848_v6 }
 0x1d4   :  { %1876 = vmatprep.subr.mxu0 %v2228_v5 }
 0x1d5   :  { %1877 = vmatpush3.msra.mxu0 %v847_v7 }
 0x1d6   :  { %1878 = vmatprep.subr.mxu0 %v2228_v5 }
 0x1d7   :  { %1879 = vmatpush3.msra.mxu0 %v846_v8 }
 0x1d8   :  { %1880 = vmatprep.subr.mxu0 %v2228_v5 }
 0x1d9   :  { %1881 = vmatpush3.msra.mxu0 %v845_v9 }
 0x25a   :  { %v531_v20 = vpop.f32.mrf.mxu0 }
 0x25b   :  { %v532_v21 = vadd.f32 %v1531_v19, %v531_v20  ;;  %v945_v19 = vld [vmem:[#allocation15 + $0x30] sm:$0xff]  ;;  %v944_v20 = vld [vmem:[#allocation15 + $0x28] sm:$0xff] }
 0x25c   :  { %v1814_v22 = vpop.f32.mrf.mxu0 }
 0x25d   :  { %v535_v23 = vmax.f32 %v532_v21, 0.0  ;;  %v943_v21 = vld [vmem:[#allocation15 + $0x20] sm:$0xff]  ;;  %v942_v22 = vld [vmem:[#allocation15 + $0x18] sm:$0xff] }
 0x25f   :  { %1848 = vmatmul.mubr.f32.vlgmr.msra.gmra.mxu1 %v535_v23  ;;  %v941_v23 = vld [vmem:[#allocation15 + $0x10] sm:$0xff] }
 0x260   :  { %1677 = vmatpush3.msra.mxu1 %v680_v24  ;;  %838 = vmatprep.mubr.f32.mxu1 %v632_v25 }
 0x261   :  { %1678 = vmatprep.subr.mxu1 %v695_v26 }
 0x262   :  { %1679 = vmatpush3.msra.mxu1 %v679_v27 }
 0x263   :  { %1680 = vmatprep.subr.mxu1 %v694_v28 }
 0x264   :  { %1681 = vmatpush3.msra.mxu1 %v678_v29  ;;  %v1533_v29 = vld [vmem:[#allocation10] ss:$0 sm:$0xff] }
 0x265   :  { %1682 = vmatprep.subr.mxu1 %v693_v30 }
 0x266   :  { %1683 = vmatpush3.msra.mxu1 %v677_v31 }
 0x267   :  { %1684 = vmatprep.subr.mxu1 %v692_v32 }
 0x268   :  { %1685 = vmatpush3.msra.mxu1 %v676_v33 }
 0x269   :  { %1686 = vmatprep.subr.mxu1 %v691_v34 }
 0x26a   :  { %1687 = vmatpush3.msra.mxu1 %v675_v35 }
 0x26b   :  { %1688 = vmatprep.subr.mxu1 %v690_v36  ;;  %v940_v36 = vld [vmem:[#allocation15 + $0x8] sm:$0xff] }
 0x26c   :  { %1689 = vmatpush3.msra.mxu1 %v674_v37  ;;  %v939_v37 = vld [vmem:[#allocation15] sm:$0xff] }
 0x26d   :  { %1690 = vmatprep.subr.mxu1 %v689_v38  ;;  %v1063_v38 = vld [vmem:[%s3373_s14 + $0xf8] sm:$0xff] }
 0x26e   :  { %1691 = vmatpush3.msra.mxu1 %v673_v39  ;;  %v1095_v39 = vld [vmem:[%s3374_s15 + $0xf8] sm:$0xff] }
 0x26f   :  { %1692 = vmatprep.subr.mxu1 %v688_v40  ;;  %v1094_v40 = vld [vmem:[%s3374_s15 + $0xf0] sm:$0xff]  ;;  %1096 = vmatprep.subr.mxu0 %v1095_v39  ;;  %v1532_v39 = vld [vmem:[#allocation9] ss:$0 sm:$0xff] }
 0x270   :  { %1693 = vmatpush3.msra.mxu1 %v672_v41  ;;  %v1093_v41 = vld [vmem:[%s3374_s15 + $0xe8] sm:$0xff] }
 0x271   :  { %1694 = vmatprep.subr.mxu1 %v687_v42  ;;  %v1092_v42 = vld [vmem:[%s3374_s15 + $0xe0] sm:$0xff] }
 0x272   :  { %1695 = vmatpush3.msra.mxu1 %v671_v43  ;;  %v1091_v43 = vld [vmem:[%s3374_s15 + $0xd8] sm:$0xff] }
 0x273   :  { %1696 = vmatprep.subr.mxu1 %v686_v44  ;;  %v1090_v44 = vld [vmem:[%s3374_s15 + $0xd0] sm:$0xff] }
 0x274   :  { %1697 = vmatpush3.msra.mxu1 %v670_v45  ;;  %v1089_v45 = vld [vmem:[%s3374_s15 + $0xc8] sm:$0xff] }
 0x275   :  { %1698 = vmatprep.subr.mxu1 %v685_v46  ;;  %v1088_v46 = vld [vmem:[%s3374_s15 + $0xc0] sm:$0xff] }
 0x276   :  { %1699 = vmatpush3.msra.mxu1 %v669_v47  ;;  %v1087_v47 = vld [vmem:[%s3374_s15 + $0xb8] sm:$0xff] }
 0x277   :  { %1700 = vmatprep.subr.mxu1 %v684_v48  ;;  %v1086_v48 = vld [vmem:[%s3374_s15 + $0xb0] sm:$0xff] }
 0x278   :  { %1701 = vmatpush3.msra.mxu1 %v668_v49  ;;  %v1085_v49 = vld [vmem:[%s3374_s15 + $0xa8] sm:$0xff] }
 0x279   :  { %1702 = vmatprep.subr.mxu1 %v683_v50  ;;  %v1084_v50 = vld [vmem:[%s3374_s15 + $0xa0] sm:$0xff] }
 0x27a   :  { %1703 = vmatpush3.msra.mxu1 %v667_v51  ;;  %v1673_v26 = vpop.f32.mrf.mxu0  ;;  %v1083_v51 = vld [vmem:[%s3374_s15 + $0x98] sm:$0xff] }
 0x27b   :  { %1704 = vmatprep.subr.mxu1 %v682_v52  ;;  %v1082_v52 = vld [vmem:[%s3374_s15 + $0x90] sm:$0xff] }
 0x27c   :  { %1705 = vmatpush3.msra.mxu1 %v666_v53  ;;  %v1674_v27 = vpop.f32.mrf.mxu0  ;;  %v1081_v53 = vld [vmem:[%s3374_s15 + $0x88] sm:$0xff] }
 0x27d   :  { %1706 = vmatprep.subr.mxu1 %v681_v54  ;;  %v1675_v28 = vadd.f32 %v1674_v27, %v1673_v26  ;;  %v1080_v54 = vld [vmem:[%s3374_s15 + $0x80] sm:$0xff]  ;;  %v1046_v26 = vld [vmem:[%s3373_s14 + $0x70] sm:$0xff]  ;;  %v1045_v27 = vld [vmem:[%s3373_s14 + $0x68] sm:$0xff] }
 0x27e   :  { %1707 = vmatpush3.msra.mxu1 %v665_v55  ;;  %v1079_v55 = vld [vmem:[%s3374_s15 + $0x78] sm:$0xff] }
 0x27f   :  { %839 = vmatmul.mubr.f32.vlgmr.msra.gmra.mxu1 %v631_v56  ;;  %1885 = vmatprep.subr.mxu1 %v2228_v5  ;;  %v771_v32 = vadd.f32 %v1675_v28, %v1533_v29  ;;  %v1078_v56 = vld [vmem:[%s3374_s15 + $0x70] sm:$0xff]  ;;  %v1044_v28 = vld [vmem:[%s3373_s14 + $0x60] sm:$0xff]  ;;  %v1043_v29 = vld [vmem:[%s3373_s14 + $0x58] sm:$0xff] }
 0x280   :  { %1917 = vmatprep.mubr.msk.f32.mxu1 %vm2229_vm0, %v2228_v5  ;;  %1886 = vmatpush3.msra.mxu1 %v954_v10  ;;  %v1062_v10 = vld [vmem:[%s3373_s14 + $0xf0] sm:$0xff] }
 0x281   :  { %1887 = vmatprep.subr.mxu1 %v2228_v5 }
 0x282   :  { %1888 = vmatpush3.msra.mxu1 %v953_v11  ;;  %v1061_v11 = vld [vmem:[%s3373_s14 + $0xe8] sm:$0xff] }
 0x283   :  { %1889 = vmatprep.subr.mxu1 %v2228_v5 }
 0x284   :  { %1890 = vmatpush3.msra.mxu1 %v952_v12  ;;  %v1060_v12 = vld [vmem:[%s3373_s14 + $0xe0] sm:$0xff] }
 0x285   :  { %1891 = vmatprep.subr.mxu1 %v2228_v5 }
 0x286   :  { %1892 = vmatpush3.msra.mxu1 %v951_v13  ;;  %v1059_v13 = vld [vmem:[%s3373_s14 + $0xd8] sm:$0xff] }
 0x287   :  { %1893 = vmatprep.subr.mxu1 %v2228_v5 }
 0x288   :  { %1894 = vmatpush3.msra.mxu1 %v950_v14  ;;  %v1058_v14 = vld [vmem:[%s3373_s14 + $0xd0] sm:$0xff] }
 0x289   :  { %1895 = vmatprep.subr.mxu1 %v2228_v5 }
 0x28a   :  { %1896 = vmatpush3.msra.mxu1 %v949_v15  ;;  %v1057_v15 = vld [vmem:[%s3373_s14 + $0xc8] sm:$0xff] }
 0x28b   :  { %1897 = vmatprep.subr.mxu1 %v2228_v5 }
 0x28c   :  { %1898 = vmatpush3.msra.mxu1 %v948_v16  ;;  %v1056_v16 = vld [vmem:[%s3373_s14 + $0xc0] sm:$0xff] }
 0x28d   :  { %1899 = vmatprep.subr.mxu1 %v2228_v5 }
 0x28e   :  { %1900 = vmatpush3.msra.mxu1 %v947_v17  ;;  %v1054_v17 = vld [vmem:[%s3373_s14 + $0xb0] sm:$0xff] }
 0x28f   :  { %1901 = vmatprep.subr.mxu1 %v2228_v5 }
 0x290   :  { %1902 = vmatpush3.msra.mxu1 %v946_v18  ;;  %v1053_v18 = vld [vmem:[%s3373_s14 + $0xa8] sm:$0xff] }
 0x291   :  { %1903 = vmatprep.subr.mxu1 %v2228_v5 }
 0x292   :  { %1904 = vmatpush3.msra.mxu1 %v945_v19  ;;  %v1052_v19 = vld [vmem:[%s3373_s14 + $0xa0] sm:$0xff] }
 0x293   :  { %1905 = vmatprep.subr.mxu1 %v2228_v5 }
 0x294   :  { %1906 = vmatpush3.msra.mxu1 %v944_v20  ;;  %v1051_v20 = vld [vmem:[%s3373_s14 + $0x98] sm:$0xff] }
 0x295   :  { %1907 = vmatprep.subr.mxu1 %v2228_v5 }
 0x296   :  { %1908 = vmatpush3.msra.mxu1 %v943_v21  ;;  %v1050_v21 = vld [vmem:[%s3373_s14 + $0x90] sm:$0xff] }
 0x297   :  { %1909 = vmatprep.subr.mxu1 %v2228_v5 }
 0x298   :  { %1910 = vmatpush3.msra.mxu1 %v942_v22  ;;  %v1049_v22 = vld [vmem:[%s3373_s14 + $0x88] sm:$0xff] }
 0x299   :  { %1911 = vmatprep.subr.mxu1 %v2228_v5 }
 0x29a   :  { %1912 = vmatpush3.msra.mxu1 %v941_v23  ;;  %v1048_v23 = vld [vmem:[%s3373_s14 + $0x80] sm:$0xff] }
 0x29b   :  { %1913 = vmatprep.subr.mxu1 %v2228_v5 }
 0x29c   :  { %1914 = vmatpush3.msra.mxu1 %v940_v36  ;;  %v1036_v36 = vld [vmem:[%s3373_s14 + $0x20] sm:$0xff] }
 0x29d   :  { %1915 = vmatprep.subr.mxu1 %v2228_v5 }
 0x29e   :  { %1916 = vmatpush3.msra.mxu1 %v939_v37  ;;  %v1035_v37 = vld [vmem:[%s3373_s14 + $0x18] sm:$0xff] }
 0x29f   :  { %1167 = vmatprep.subr.mxu1 %v1063_v38  ;;  %v1034_v38 = vld [vmem:[%s3373_s14 + $0x10] sm:$0xff] }
 0x31f   :  { %v2870_v24 = vpop.f32.mrf.mxu1 }
 0x321   :  { %v1849_v25 = vpop.f32.mrf.mxu1 }
 0x322   :  { %v1047_v25 = vld [vmem:[%s3373_s14 + $0x78] sm:$0xff] }
 0x33f   :  { %v1708_v30 = vpop.f32.mrf.mxu1 }
 0x341   :  { %v1709_v31 = vpop.f32.mrf.mxu1 }
 0x342   :  { %v1710_v33 = vadd.f32 %v1709_v31, %v1708_v30  ;;  %v1042_v30 = vld [vmem:[%s3373_s14 + $0x50] sm:$0xff]  ;;  %v1041_v31 = vld [vmem:[%s3373_s14 + $0x48] sm:$0xff] }
 0x344   :  { %v841_v34 = vadd.f32 %v1710_v33, %v771_v32  ;;  %v1040_v32 = vld [vmem:[%s3373_s14 + $0x40] sm:$0xff]  ;;  %v1039_v33 = vld [vmem:[%s3373_s14 + $0x38] sm:$0xff] }
 0x346   :  { %v844_v35 = vmax.f32 %v841_v34, 0.0  ;;  %v1038_v34 = vld [vmem:[%s3373_s14 + $0x30] sm:$0xff] }
 0x348   :  { %1883 = vmatmul.mubr.f32.vlgmr.msra.gmra.mxu0 %v844_v35  ;;  %v1037_v35 = vld [vmem:[%s3373_s14 + $0x28] sm:$0xff] }
 0x349   :  { %1160 = vmatprep.mubr.f32.mxu0 %v2228_v5  ;;  %1097 = vmatpush1.msra.mxu0 %v1094_v40  ;;  %v1033_v40 = vld [vmem:[%s3373_s14 + $0x8] sm:$0xff] }
 0x34a   :  { %1098 = vmatprep.subr.mxu0 %v1093_v41  ;;  %v1032_v41 = vld [vmem:[%s3373_s14] sm:$0xff] }
 0x34b   :  { %1099 = vmatpush1.msra.mxu0 %v1092_v42  ;;  %v626_v42 = vadd.f32 %v1532_v39, %v2870_v24  ;;  %v1285_v24 = vld [vmem:[%s3376_s17 + $0xf8] sm:$0xff]  ;;  %v1296_v39 = vld [vmem:[%s3376_s17 + $0x150] sm:$0xff] }
 0x34c   :  { %1100 = vmatprep.subr.mxu0 %v1091_v43  ;;  %v1066_v43 = vld [vmem:[%s3374_s15 + $0x10] sm:$0xff] }
 0x34d   :  { %1101 = vmatpush1.msra.mxu0 %v1090_v44  ;;  %v1065_v44 = vld [vmem:[%s3374_s15 + $0x8] sm:$0xff] }
 0x34e   :  { %1102 = vmatprep.subr.mxu0 %v1089_v45  ;;  %v1064_v45 = vld [vmem:[%s3374_s15] sm:$0xff] }
 0x34f   :  { %1103 = vmatpush1.msra.mxu0 %v1088_v46  ;;  %v1535_v46 = vld [vmem:[#allocation16] ss:$0 sm:$0xff] }
 0x350   :  { %1104 = vmatprep.subr.mxu0 %v1087_v47 }
 0x351   :  { %1105 = vmatpush1.msra.mxu0 %v1086_v48 }
 0x352   :  { %1106 = vmatprep.subr.mxu0 %v1085_v49  ;;  %v1284_v49 = vld [vmem:[%s3376_s17 + $0xf0] sm:$0xff] }
 0x353   :  { %1107 = vmatpush1.msra.mxu0 %v1084_v50 }
 0x354   :  { %1108 = vmatprep.subr.mxu0 %v1083_v51  ;;  %v1283_v51 = vld [vmem:[%s3376_s17 + $0xe8] sm:$0xff] }
 0x355   :  { %1109 = vmatpush1.msra.mxu0 %v1082_v52  ;;  %v1282_v52 = vld [vmem:[%s3376_s17 + $0xe0] sm:$0xff] }
 0x356   :  { %1110 = vmatprep.subr.mxu0 %v1081_v53  ;;  %v1281_v53 = vld [vmem:[%s3376_s17 + $0xd8] sm:$0xff] }
 0x357   :  { %1111 = vmatpush1.msra.mxu0 %v1080_v54  ;;  %v1280_v54 = vld [vmem:[%s3376_s17 + $0xd0] sm:$0xff] }
 0x358   :  { %1112 = vmatprep.subr.mxu0 %v1079_v55  ;;  %v1279_v55 = vld [vmem:[%s3376_s17 + $0xc8] sm:$0xff] }
 0x359   :  { %1113 = vmatpush1.msra.mxu0 %v1078_v56  ;;  %v1278_v56 = vld [vmem:[%s3376_s17 + $0xc0] sm:$0xff] }
 0x35a   :  { %1114 = vmatprep.subr.mxu0 %v1077_v57  ;;  %v1277_v57 = vld [vmem:[%s3376_s17 + $0xb8] sm:$0xff] }
 0x35b   :  { %1115 = vmatpush1.msra.mxu0 %v1076_v58  ;;  %v1276_v58 = vld [vmem:[%s3376_s17 + $0xb0] sm:$0xff] }
 0x35c   :  { %1116 = vmatprep.subr.mxu0 %v1075_v59  ;;  %v1275_v59 = vld [vmem:[%s3376_s17 + $0xa8] sm:$0xff] }
 0x35d   :  { %1117 = vmatpush1.msra.mxu0 %v1074_v60  ;;  %v1274_v60 = vld [vmem:[%s3376_s17 + $0xa0] sm:$0xff] }
 0x35e   :  { %1118 = vmatprep.subr.mxu0 %v1073_v61  ;;  %v1273_v61 = vld [vmem:[%s3376_s17 + $0x98] sm:$0xff] }
 0x35f   :  { %1119 = vmatpush1.msra.mxu0 %v1072_v62  ;;  %v1272_v62 = vld [vmem:[%s3376_s17 + $0x90] sm:$0xff] }
 0x360   :  { %1120 = vmatprep.subr.mxu0 %v1071_v63  ;;  %v1271_v63 = vld [vmem:[%s3376_s17 + $0x88] sm:$0xff] }
 0x361   :  { %1121 = vmatpush1.msra.mxu0 %v1070_v0  ;;  %v1270_v0 = vld [vmem:[%s3376_s17 + $0x80] sm:$0xff] }
 0x362   :  { %1122 = vmatprep.subr.mxu0 %v1069_v1  ;;  %v1269_v1 = vld [vmem:[%s3376_s17 + $0x78] sm:$0xff] }
 0x363   :  { %1123 = vmatpush1.msra.mxu0 %v1068_v2  ;;  %v1268_v2 = vld [vmem:[%s3376_s17 + $0x70] sm:$0xff] }
 0x364   :  { %1124 = vmatprep.subr.mxu0 %v1067_v3  ;;  %v1267_v3 = vld [vmem:[%s3376_s17 + $0x68] sm:$0xff] }
 0x365   :  { %1125 = vmatpush1.msra.mxu0 %v1066_v43  ;;  %v1292_v43 = vld [vmem:[%s3376_s17 + $0x130] sm:$0xff] }
 0x366   :  { %1126 = vmatprep.subr.mxu0 %v1065_v44  ;;  %v1291_v44 = vld [vmem:[%s3376_s17 + $0x128] sm:$0xff] }
 0x367   :  { %1127 = vmatpush1.msra.mxu0 %v1064_v45  ;;  %v1290_v45 = vld [vmem:[%s3376_s17 + $0x120] sm:$0xff] }
 0x368   :  { %1330 = vmatprep.subr.mxu0 %v1285_v24  ;;  %v1289_v24 = vld [vmem:[%s3376_s17 + $0x118] sm:$0xff] }
 0x408   :  { %v934_v6 = vpop.f32.mrf.mxu0 }
 0x409   :  { %v935_v7 = vadd.f32 %v1534_v4, %v934_v6  ;;  %v1266_v4 = vld [vmem:[%s3376_s17 + $0x60] sm:$0xff]  ;;  %v1265_v6 = vld [vmem:[%s3376_s17 + $0x58] sm:$0xff] }
 0x40a   :  { %v1884_v8 = vpop.f32.mrf.mxu0 }
 0x40b   :  { %v938_v9 = vmax.f32 %v935_v7, 0.0  ;;  %v1264_v7 = vld [vmem:[%s3376_s17 + $0x50] sm:$0xff]  ;;  %v1263_v8 = vld [vmem:[%s3376_s17 + $0x48] sm:$0xff] }
 0x40d   :  { %1918 = vmatmul.mubr.f32.vlgmr.msra.gmra.mxu1 %v938_v9  ;;  %v1262_v9 = vld [vmem:[%s3376_s17 + $0x40] sm:$0xff] }
 0x40e   :  { %1168 = vmatpush1.msra.mxu1 %v1062_v10  ;;  %1231 = vmatprep.mubr.f32.mxu1 %v2228_v5  ;;  %v1055_v5 = vld [vmem:[%s3373_s14 + $0xb8] sm:$0xff] }
 0x40f   :  { %1169 = vmatprep.subr.mxu1 %v1061_v11  ;;  %v1261_v10 = vld [vmem:[%s3376_s17 + $0x38] sm:$0xff]  ;;  %v1260_v11 = vld [vmem:[%s3376_s17 + $0x30] sm:$0xff] }
 0x410   :  { %1170 = vmatpush1.msra.mxu1 %v1060_v12  ;;  %v1259_v12 = vld [vmem:[%s3376_s17 + $0x28] sm:$0xff] }
 0x411   :  { %1171 = vmatprep.subr.mxu1 %v1059_v13  ;;  %v1258_v13 = vld [vmem:[%s3376_s17 + $0x20] sm:$0xff] }
 0x412   :  { %1172 = vmatpush1.msra.mxu1 %v1058_v14  ;;  %v1257_v14 = vld [vmem:[%s3376_s17 + $0x18] sm:$0xff] }
 0x413   :  { %1173 = vmatprep.subr.mxu1 %v1057_v15  ;;  %v1256_v15 = vld [vmem:[%s3376_s17 + $0x10] sm:$0xff] }
 0x414   :  { %1174 = vmatpush1.msra.mxu1 %v1056_v16  ;;  %v1255_v16 = vld [vmem:[%s3376_s17 + $0x8] sm:$0xff] }
 0x415   :  { %1175 = vmatprep.subr.mxu1 %v1055_v5  ;;  %v1254_v5 = vld [vmem:[%s3376_s17] sm:$0xff] }
 0x416   :  { %1176 = vmatpush1.msra.mxu1 %v1054_v17  ;;  %v1317_v17 = vld [vmem:[%s3376_s17 + $0x1f8] sm:$0xff] }
 0x417   :  { %1177 = vmatprep.subr.mxu1 %v1053_v18  ;;  %v1316_v18 = vld [vmem:[%s3376_s17 + $0x1f0] sm:$0xff] }
 0x418   :  { %1178 = vmatpush1.msra.mxu1 %v1052_v19  ;;  %v1315_v19 = vld [vmem:[%s3376_s17 + $0x1e8] sm:$0xff] }
 0x419   :  { %1179 = vmatprep.subr.mxu1 %v1051_v20  ;;  %v1314_v20 = vld [vmem:[%s3376_s17 + $0x1e0] sm:$0xff] }
 0x41a   :  { %1180 = vmatpush1.msra.mxu1 %v1050_v21  ;;  %v1313_v21 = vld [vmem:[%s3376_s17 + $0x1d8] sm:$0xff] }
 0x41b   :  { %1181 = vmatprep.subr.mxu1 %v1049_v22  ;;  %v1312_v22 = vld [vmem:[%s3376_s17 + $0x1d0] sm:$0xff] }
 0x41c   :  { %1182 = vmatpush1.msra.mxu1 %v1048_v23  ;;  %v1311_v23 = vld [vmem:[%s3376_s17 + $0x1c8] sm:$0xff] }
 0x41d   :  { %1183 = vmatprep.subr.mxu1 %v1047_v25  ;;  %v1310_v25 = vld [vmem:[%s3376_s17 + $0x1c0] sm:$0xff] }
 0x41e   :  { %1184 = vmatpush1.msra.mxu1 %v1046_v26  ;;  %v1309_v26 = vld [vmem:[%s3376_s17 + $0x1b8] sm:$0xff] }
 0x41f   :  { %1185 = vmatprep.subr.mxu1 %v1045_v27  ;;  %v1308_v27 = vld [vmem:[%s3376_s17 + $0x1b0] sm:$0xff] }
 0x420   :  { %1186 = vmatpush1.msra.mxu1 %v1044_v28  ;;  %v1307_v28 = vld [vmem:[%s3376_s17 + $0x1a8] sm:$0xff] }
 0x421   :  { %1187 = vmatprep.subr.mxu1 %v1043_v29  ;;  %v1306_v29 = vld [vmem:[%s3376_s17 + $0x1a0] sm:$0xff] }
 0x422   :  { %1188 = vmatpush1.msra.mxu1 %v1042_v30  ;;  %v1305_v30 = vld [vmem:[%s3376_s17 + $0x198] sm:$0xff] }
 0x423   :  { %1189 = vmatprep.subr.mxu1 %v1041_v31  ;;  %v1304_v31 = vld [vmem:[%s3376_s17 + $0x190] sm:$0xff] }
 0x424   :  { %1190 = vmatpush1.msra.mxu1 %v1040_v32  ;;  %v1303_v32 = vld [vmem:[%s3376_s17 + $0x188] sm:$0xff] }
 0x425   :  { %1191 = vmatprep.subr.mxu1 %v1039_v33  ;;  %v1302_v33 = vld [vmem:[%s3376_s17 + $0x180] sm:$0xff] }
 0x426   :  { %1192 = vmatpush1.msra.mxu1 %v1038_v34  ;;  %v1301_v34 = vld [vmem:[%s3376_s17 + $0x178] sm:$0xff] }
 0x427   :  { %1193 = vmatprep.subr.mxu1 %v1037_v35  ;;  %v1300_v35 = vld [vmem:[%s3376_s17 + $0x170] sm:$0xff] }
 0x428   :  { %1194 = vmatpush1.msra.mxu1 %v1036_v36  ;;  %v1299_v36 = vld [vmem:[%s3376_s17 + $0x168] sm:$0xff] }
 0x429   :  { %1195 = vmatprep.subr.mxu1 %v1035_v37  ;;  %v1298_v37 = vld [vmem:[%s3376_s17 + $0x160] sm:$0xff] }
 0x42a   :  { %1196 = vmatpush1.msra.mxu1 %v1034_v38  ;;  %v1297_v38 = vld [vmem:[%s3376_s17 + $0x158] sm:$0xff] }
 0x42b   :  { %1197 = vmatprep.subr.mxu1 %v1033_v40  ;;  %v1295_v40 = vld [vmem:[%s3376_s17 + $0x148] sm:$0xff] }
 0x42c   :  { %1198 = vmatpush1.msra.mxu1 %v1032_v41  ;;  %v1294_v41 = vld [vmem:[%s3376_s17 + $0x140] sm:$0xff] }
 0x42d   :  { %1232 = vmatmul.mubr.f32.vlgmr.msra.gmra.mxu1 %v626_v42  ;;  %v1293_v42 = vld [vmem:[%s3376_s17 + $0x138] sm:$0xff] }
 0x4cd   :  { %v1028_v47 = vpop.f32.mrf.mxu1 }
 0x4ce   :  { %v1029_v48 = vadd.f32 %v1535_v46, %v1028_v47  ;;  %v1288_v46 = vld [vmem:[%s3376_s17 + $0x110] sm:$0xff]  ;;  %v1287_v47 = vld [vmem:[%s3376_s17 + $0x108] sm:$0xff] }
 0x4cf   :  { %v1919_v50 = vpop.f32.mrf.mxu1 }
 0x4d0   :  { %1161 = vmatmul.mubr.f32.vlgmr.msra.gmra.mxu0 %v1029_v48  ;;  %v1286_v48 = vld [vmem:[%s3376_s17 + $0x100] sm:$0xff]  ;;  %v1418_v50 = vld [vmem:[%s3378_s19 + $0x78] sm:$0xff] }
 0x4d1   :  { %1331 = vmatpush1.msra.mxu0 %v1284_v49  ;;  %v1434_v49 = vld [vmem:[%s3378_s19 + $0xf8] sm:$0xff] }
 0x4d2   :  { %1332 = vmatprep.subr.mxu0 %v1283_v51  ;;  %v1433_v51 = vld [vmem:[%s3378_s19 + $0xf0] sm:$0xff]  ;;  %1745 = vmatprep.subr.mxu1 %v1434_v49 }
 0x4d3   :  { %1333 = vmatpush1.msra.mxu0 %v1282_v52  ;;  %v1417_v52 = vld [vmem:[%s3378_s19 + $0x70] sm:$0xff]  ;;  %1746 = vmatpush3.msra.mxu1 %v1418_v50 }
 0x4d4   :  { %1334 = vmatprep.subr.mxu0 %v1281_v53  ;;  %v1432_v53 = vld [vmem:[%s3378_s19 + $0xe8] sm:$0xff]  ;;  %1747 = vmatprep.subr.mxu1 %v1433_v51 }
 0x4d5   :  { %1335 = vmatpush1.msra.mxu0 %v1280_v54  ;;  %v1416_v54 = vld [vmem:[%s3378_s19 + $0x68] sm:$0xff]  ;;  %1748 = vmatpush3.msra.mxu1 %v1417_v52 }
 0x4d6   :  { %1336 = vmatprep.subr.mxu0 %v1279_v55  ;;  %v1431_v55 = vld [vmem:[%s3378_s19 + $0xe0] sm:$0xff]  ;;  %1749 = vmatprep.subr.mxu1 %v1432_v53 }
 0x4d7   :  { %1337 = vmatpush1.msra.mxu0 %v1278_v56  ;;  %v1415_v56 = vld [vmem:[%s3378_s19 + $0x60] sm:$0xff]  ;;  %1750 = vmatpush3.msra.mxu1 %v1416_v54 }
 0x4d8   :  { %1338 = vmatprep.subr.mxu0 %v1277_v57  ;;  %v1430_v57 = vld [vmem:[%s3378_s19 + $0xd8] sm:$0xff]  ;;  %1751 = vmatprep.subr.mxu1 %v1431_v55 }
 0x4d9   :  { %1339 = vmatpush1.msra.mxu0 %v1276_v58  ;;  %v1414_v58 = vld [vmem:[%s3378_s19 + $0x58] sm:$0xff]  ;;  %1752 = vmatpush3.msra.mxu1 %v1415_v56 }
 0x4da   :  { %1340 = vmatprep.subr.mxu0 %v1275_v59  ;;  %v1429_v59 = vld [vmem:[%s3378_s19 + $0xd0] sm:$0xff]  ;;  %1753 = vmatprep.subr.mxu1 %v1430_v57 }
 0x4db   :  { %1341 = vmatpush1.msra.mxu0 %v1274_v60  ;;  %v1413_v60 = vld [vmem:[%s3378_s19 + $0x50] sm:$0xff]  ;;  %1754 = vmatpush3.msra.mxu1 %v1414_v58 }
 0x4dc   :  { %1342 = vmatprep.subr.mxu0 %v1273_v61  ;;  %v1428_v61 = vld [vmem:[%s3378_s19 + $0xc8] sm:$0xff]  ;;  %1755 = vmatprep.subr.mxu1 %v1429_v59 }
 0x4dd   :  { %1343 = vmatpush1.msra.mxu0 %v1272_v62  ;;  %v1412_v62 = vld [vmem:[%s3378_s19 + $0x48] sm:$0xff]  ;;  %1756 = vmatpush3.msra.mxu1 %v1413_v60 }
 0x4de   :  { %1344 = vmatprep.subr.mxu0 %v1271_v63  ;;  %v1427_v63 = vld [vmem:[%s3378_s19 + $0xc0] sm:$0xff]  ;;  %1757 = vmatprep.subr.mxu1 %v1428_v61 }
 0x4df   :  { %1345 = vmatpush1.msra.mxu0 %v1270_v0  ;;  %v1411_v0 = vld [vmem:[%s3378_s19 + $0x40] sm:$0xff]  ;;  %1758 = vmatpush3.msra.mxu1 %v1412_v62 }
 0x4e0   :  { %1346 = vmatprep.subr.mxu0 %v1269_v1  ;;  %v1426_v1 = vld [vmem:[%s3378_s19 + $0xb8] sm:$0xff]  ;;  %1759 = vmatprep.subr.mxu1 %v1427_v63 }
 0x4e1   :  { %1347 = vmatpush1.msra.mxu0 %v1268_v2  ;;  %v1410_v2 = vld [vmem:[%s3378_s19 + $0x38] sm:$0xff]  ;;  %1760 = vmatpush3.msra.mxu1 %v1411_v0 }
 0x4e2   :  { %1348 = vmatprep.subr.mxu0 %v1267_v3  ;;  %v1425_v3 = vld [vmem:[%s3378_s19 + $0xb0] sm:$0xff]  ;;  %1761 = vmatprep.subr.mxu1 %v1426_v1 }
 0x4e3   :  { %1349 = vmatpush1.msra.mxu0 %v1266_v4  ;;  %v1409_v4 = vld [vmem:[%s3378_s19 + $0x30] sm:$0xff]  ;;  %1762 = vmatpush3.msra.mxu1 %v1410_v2 }
 0x4e4   :  { %1350 = vmatprep.subr.mxu0 %v1265_v6  ;;  %v1424_v6 = vld [vmem:[%s3378_s19 + $0xa8] sm:$0xff]  ;;  %1763 = vmatprep.subr.mxu1 %v1425_v3 }
 0x4e5   :  { %1351 = vmatpush1.msra.mxu0 %v1264_v7  ;;  %v1408_v7 = vld [vmem:[%s3378_s19 + $0x28] sm:$0xff]  ;;  %1764 = vmatpush3.msra.mxu1 %v1409_v4 }
 0x4e6   :  { %1352 = vmatprep.subr.mxu0 %v1263_v8  ;;  %v1423_v8 = vld [vmem:[%s3378_s19 + $0xa0] sm:$0xff]  ;;  %1765 = vmatprep.subr.mxu1 %v1424_v6 }
 0x4e7   :  { %1353 = vmatpush1.msra.mxu0 %v1262_v9  ;;  %v1407_v9 = vld [vmem:[%s3378_s19 + $0x20] sm:$0xff]  ;;  %1766 = vmatpush3.msra.mxu1 %v1408_v7 }
 0x4e8   :  { %1354 = vmatprep.subr.mxu0 %v1261_v10  ;;  %1767 = vmatprep.subr.mxu1 %v1423_v8  ;;  %v1240_v10 = vlaneseq }
 0x4e9   :  { %1355 = vmatpush1.msra.mxu0 %v1260_v11  ;;  %1768 = vmatpush3.msra.mxu1 %v1407_v9 }
 0x4ea   :  { %1356 = vmatprep.subr.mxu0 %v1259_v12  ;;  %v1241_v11 = vshrl.u32 %v1240_v10, 7 }
 0x4eb   :  { %1357 = vmatpush1.msra.mxu0 %v1258_v13  ;;  %v1238_v13 = vld [vmem:[#allocation18] sm:$0x3] }
 0x4ec   :  { %1358 = vmatprep.subr.mxu0 %v1257_v14  ;;  %v1242_v12 = vsub.s32 0, %v1241_v11  ;;  %v1246_v14 = vsub.s32 1, %v1241_v11 }
 0x4ed   :  { %1359 = vmatpush1.msra.mxu0 %v1256_v15  ;;  %v1233_v15 = vpop.f32.mrf.mxu1 }
 0x4ee   :  { %1360 = vmatprep.subr.mxu0 %v1255_v16 }
 0x4ef   :  { %1361 = vmatpush1.msra.mxu0 %v1254_v5  ;;  %v1243_v5 = vrot.slane %v1238_v13, %v1242_v12 }
 0x4f0   :  { %1362 = vmatprep.subr.mxu0 %v1317_v17 }
 0x4f1   :  { %1363 = vmatpush2.msra.mxu0 %v1316_v18  ;;  %v1247_v18 = vrot.slane %v1238_v13, %v1246_v14 }
 0x4f2   :  { %1364 = vmatprep.subr.mxu0 %v1315_v19  ;;  %v1235_v19 = vpop.f32.mrf.mxu1 }
 0x4f3   :  { %1365 = vmatpush2.msra.mxu0 %v1314_v20 }
 0x4f4   :  { %1366 = vmatprep.subr.mxu0 %v1313_v21 }
 0x4f5   :  { %1367 = vmatpush2.msra.mxu0 %v1312_v22 }
 0x4f6   :  { %1368 = vmatprep.subr.mxu0 %v1311_v23 }
 0x4f7   :  { %1369 = vmatpush2.msra.mxu0 %v1310_v25 }
 0x4f8   :  { %1370 = vmatprep.subr.mxu0 %v1309_v26 }
 0x4f9   :  { %1371 = vmatpush2.msra.mxu0 %v1308_v27  ;;  %v1422_v27 = vld [vmem:[%s3378_s19 + $0x98] sm:$0xff] }
 0x4fa   :  { %1372 = vmatprep.subr.mxu0 %v1307_v28  ;;  %1769 = vmatprep.subr.mxu1 %v1422_v27  ;;  %v1406_v28 = vld [vmem:[%s3378_s19 + $0x18] sm:$0xff] }
 0x4fb   :  { %1373 = vmatpush2.msra.mxu0 %v1306_v29  ;;  %1770 = vmatpush3.msra.mxu1 %v1406_v28  ;;  %v1421_v29 = vld [vmem:[%s3378_s19 + $0x90] sm:$0xff] }
 0x4fc   :  { %1374 = vmatprep.subr.mxu0 %v1305_v30  ;;  %1771 = vmatprep.subr.mxu1 %v1421_v29  ;;  %v1405_v30 = vld [vmem:[%s3378_s19 + $0x10] sm:$0xff] }
 0x4fd   :  { %1375 = vmatpush2.msra.mxu0 %v1304_v31  ;;  %1772 = vmatpush3.msra.mxu1 %v1405_v30  ;;  %v1420_v31 = vld [vmem:[%s3378_s19 + $0x88] sm:$0xff] }
 0x4fe   :  { %1376 = vmatprep.subr.mxu0 %v1303_v32  ;;  %1773 = vmatprep.subr.mxu1 %v1420_v31  ;;  %v1404_v32 = vld [vmem:[%s3378_s19 + $0x8] sm:$0xff] }
 0x4ff   :  { %1377 = vmatpush2.msra.mxu0 %v1302_v33  ;;  %v1419_v33 = vld [vmem:[%s3378_s19 + $0x80] sm:$0xff]  ;;  %1774 = vmatpush3.msra.mxu1 %v1404_v32 }
 0x500   :  { %1378 = vmatprep.subr.mxu0 %v1301_v34  ;;  %v1403_v34 = vld [vmem:[%s3378_s19] sm:$0xff]  ;;  %1775 = vmatprep.subr.mxu1 %v1419_v33 }
 0x501   :  { %1379 = vmatpush2.msra.mxu0 %v1300_v35  ;;  %1776 = vmatpush3.msra.mxu1 %v1403_v34  ;;  %v1318_v35 = vld [vmem:[#allocation19] sm:$0x3] }
 0x502   :  { %1380 = vmatprep.subr.mxu0 %v1299_v36  ;;  %v1323_v36 = vrot.slane %v1318_v35, %v1242_v12 }
 0x503   :  { %1381 = vmatpush2.msra.mxu0 %v1298_v37  ;;  %v1327_v37 = vrot.slane %v1318_v35, %v1246_v14 }
 0x504   :  { %1382 = vmatprep.subr.mxu0 %v1297_v38 }
 0x505   :  { %1383 = vmatpush2.msra.mxu0 %v1296_v39 }
 0x506   :  { %1384 = vmatprep.subr.mxu0 %v1295_v40 }
 0x507   :  { %1385 = vmatpush2.msra.mxu0 %v1294_v41 }
 0x508   :  { %1386 = vmatprep.subr.mxu0 %v1293_v42 }
 0x509   :  { %1387 = vmatpush2.msra.mxu0 %v1292_v43 }
 0x50a   :  { %1388 = vmatprep.subr.mxu0 %v1291_v44 }
 0x50b   :  { %1389 = vmatpush2.msra.mxu0 %v1290_v45 }
 0x50c   :  { %1390 = vmatprep.subr.mxu0 %v1289_v24  ;;  %v1536_v24 = vld [vmem:[#allocation21] ss:$0 sm:$0xff] }
 0x50d   :  { %1391 = vmatpush2.msra.mxu0 %v1288_v46 }
 0x50e   :  { %1392 = vmatprep.subr.mxu0 %v1287_v47 }
 0x50f   :  { %1393 = vmatpush2.msra.mxu0 %v1286_v48 }
 0x590   :  { %v1162_v16 = vpop.f32.mrf.mxu0 }
 0x591   :  { %v1234_v17 = vadd.f32 %v1233_v15, %v1162_v16 }
 0x592   :  { %v1164_v20 = vpop.f32.mrf.mxu0 }
 0x593   :  { %v1236_v21 = vadd.f32 %v1235_v19, %v1164_v20  ;;  %v1250_v22 = vadd.f32 %v1243_v5, %v1234_v17 }
 0x595   :  { %v1251_v23 = vadd.f32 %v1247_v18, %v1236_v21  ;;  %v1252_v26 = vmax.f32 %v1250_v22, 0.0 }
 0x597   :  { %v1253_v25 = vmax.f32 %v1251_v23, 0.0 }
 0x599   :  { %1394 = vmatprep.mubr.f32.mxu0 %v1253_v25 }
 0x59a   :  { %1395 = vmatmul.mubr.f32.vlgmr.msra.gmra.mxu0 %v1252_v26 }
 0x65a   :  { %v1396_v38 = vpop.f32.mrf.mxu0 }
 0x65b   :  { %v1397_v39 = vadd.f32 %v1396_v38, %v1323_v36 }
 0x65c   :  { %v1398_v40 = vpop.f32.mrf.mxu0 }
 0x65d   :  { %v1399_v41 = vadd.f32 %v1398_v40, %v1327_v37  ;;  %v1401_v43 = vmax.f32 %v1397_v39, 0.0 }
 0x65f   :  { %v1402_v42 = vmax.f32 %v1399_v41, 0.0 }
 0x661   :  { %1506 = vmatprep.mubr.f32.mxu1 %v1402_v42 }
 0x662   :  { %1507 = vmatmul.mubr.f32.vlgmr.msra.gmra.mxu1 %v1401_v43 }
 0x722   :  { %v1777_v44 = vpop.f32.mrf.mxu1 }
 0x724   :  { %v1778_v45 = vpop.f32.mrf.mxu1 }
 0x725   :  { %v1779_v46 = vadd.f32 %v1778_v45, %v1777_v44 }
 0x727   :  { %v1509_v47 = vadd.f32 %v1779_v46, %v1536_v24 }
 0x729   :  { %v1512_v48 = vmul.f32 %v1509_v47, %v1509_v47 }
 0x72b   :  { %1513 = vadd.xlane.f32.xlu0 %v1512_v48 }
 0x7b4   :  { %v1514_v49 = vpop.xlane.xlu0 %1513 }
 0x7b5   :  { %v1515_v50 = vmax.f32 %v1514_v49, 1e-24 }
 0x7b7   :  { %1937 = vrsqrt.f32 %v1515_v50 }
 0x7c4   :  { %v1938_v51 = vpop.eup %1937 }
 0x7c5   :  { %v1517_v52 = vmul.f32 %v1938_v51, %v1509_v47 }
 0x7c7   :  { %1518 = vst [vmem:[%s3380_s21] sm:$0xff] %v1517_v52 }
 0x7c8   :  { %1523 = vsyncpa [#allocation3], 1 }
 0x7c9   :  { %1524 = vsyncpa [#allocation5], 1 }
 0x7ca   :  { %1525 = vsyncpa [#allocation8], 1 }
 0x7cb   :  { %1526 = vsyncpa [#allocation11], 1 }
 0x7cc   :  { %1527 = vsyncpa [#allocation14], 1 }
 0x7cd   :  { %1528 = vsyncpa [#allocation17], 1 }
 0x7ce   :  { %1529 = vsyncpa [#allocation20], 1 }

</bundles_post_ra>
